<compile_context>
chip_gen: v5e
topology: v5e:2x2
jax: 0.10.0
libtpu: 0.0.40
codegen_flags: <defaults>
</compile_context>

<pallas_src>
import functools

import jax
import jax.numpy as jnp
from jax.experimental import pallas as pl
from jax.experimental.pallas import tpu as pltpu


# ---------------------------------------------------------------------------
# Kernel bodies
# ---------------------------------------------------------------------------

def _se_mlp(m, w1, b1, w2, b2, use_mxu):
    """reduce(C->S) + SiLU + expand(S->C) + sigmoid on per-image means m:(Nb,C)."""
    if use_mxu:
        # Large C/S: route the contractions through the (otherwise idle) MXU.
        s = jax.lax.dot_general(m, w1, (((1,), (1,)), ((), ())),
                                preferred_element_type=jnp.float32)
        s = s + b1
        s = s * jax.nn.sigmoid(s)                                    # SiLU
        e = jax.lax.dot_general(s, w2, (((1,), (1,)), ((), ())),
                                preferred_element_type=jnp.float32)
        e = e + b2
    else:
        # Tiny C/S: broadcast-mul + lane reduce on VPU/XLU (MXU not worth it).
        s = jnp.sum(m[:, None, :] * w1[None, :, :], axis=-1) + b1    # (Nb, S)
        s = s * jax.nn.sigmoid(s)                                    # SiLU
        e = jnp.sum(s[:, None, :] * w2[None, :, :], axis=-1) + b2    # (Nb, C)
    return jax.nn.sigmoid(e)                                         # (Nb, C)


def _se_fused_kernel(x_ref, w1_ref, b1_ref, w2_ref, b2_ref, o_ref, *, use_mxu):
    """Single-pass path: whole (Nb, C, HW) block resident in VMEM."""
    x = x_ref[...]                                       # keep input dtype
    hw = x.shape[-1]
    # squeeze: spatial mean, f32 accumulation fused into the reduce (no f32 copy)
    m = jnp.sum(x, axis=-1, dtype=jnp.float32) * (1.0 / hw)          # (Nb, C)
    scale = _se_mlp(m, w1_ref[...], b1_ref[...], w2_ref[...], b2_ref[...],
                    use_mxu)                                          # (Nb, C)
    # excite: per-(n, c) scalar broadcast over HW lanes, in input dtype
    o_ref[...] = (x * scale[:, :, None].astype(x.dtype)).astype(o_ref.dtype)


def _mean_kernel(x_ref, sum_ref, *, hw_total, hw_tile):
    """Tiled-path pass 1: accumulate spatial sums over HW tiles -> means."""
    h = pl.program_id(1)

    @pl.when(h == 0)
    def _():
        sum_ref[...] = jnp.zeros_like(sum_ref)

    x = x_ref[...]                                       # (nb, C, hw_tile)
    if hw_total % hw_tile != 0:
        # mask the out-of-bounds tail lanes of the last tile
        lane = jax.lax.broadcasted_iota(jnp.int32, x.shape, 2) + h * hw_tile
        x = jnp.where(lane < hw_total, x, jnp.zeros_like(x))
    sum_ref[...] += jnp.sum(x, axis=-1, dtype=jnp.float32)

    @pl.when(h == pl.num_programs(1) - 1)
    def _():
        sum_ref[...] *= (1.0 / hw_total)


def _scale_kernel(mean_ref, w1_ref, b1_ref, w2_ref, b2_ref, x_ref, o_ref,
                  *, use_mxu):
    """Tiled-path pass 2: recompute the tiny gate per tile and apply it."""
    scale = _se_mlp(mean_ref[...], w1_ref[...], b1_ref[...], w2_ref[...],
                    b2_ref[...], use_mxu)                             # (nb, C)
    x = x_ref[...]
    o_ref[...] = (x * scale[:, :, None].astype(x.dtype)).astype(o_ref.dtype)


# ---------------------------------------------------------------------------
# Chip-aware sizing helpers
# ---------------------------------------------------------------------------

def _chip_info():
    """(vmem_capacity_bytes, num_tensorcores_per_chip) with safe fallbacks."""
    vmem_cap = 64 * 1024 * 1024          # conservative (v7x-sized) fallback
    try:
        info = pltpu.get_tpu_info()
        cap = getattr(info, "vmem_capacity_bytes", None)
        if cap:
            vmem_cap = int(cap)
    except Exception:
        pass
    num_tc = 1
    try:
        kind = jax.devices()[0].device_kind.lower()
        if "7" in kind:                  # v7x: 2 TensorCores / chip
            num_tc = 2
    except Exception:
        pass
    return vmem_cap, num_tc


def _pick_batch_block(n, per_batch_bytes, target_bytes, num_tensorcores):
    """Size-driven batch block; on multi-TC chips prefer an even grid >= 2."""
    nb = max(1, min(n, target_bytes // max(per_batch_bytes, 1)))
    if num_tensorcores >= 2 and n >= 2:
        nb = min(nb, -(-n // 2))                       # >= 2 grid steps
        for cand in range(nb, max(nb // 2, 1) - 1, -1):
            if (-(-n // cand)) % 2 == 0:               # even step count
                nb = cand
                break
    return nb


# ---------------------------------------------------------------------------
# Wrapper
# ---------------------------------------------------------------------------

def squeeze_excite(x_nchw, w_reduce, b_reduce, w_expand, b_expand,
                   *, force_tiled=False, hw_tile=None):
    """x_nchw: (N, C, H, W) with C == expand_c.
    w_reduce: (squeeze_c, expand_c)   (Conv2d weight (S, C, 1, 1) squeezed)
    b_reduce: (squeeze_c,)
    w_expand: (expand_c, squeeze_c)
    b_expand: (expand_c,)
    """
    N, C, H, W = x_nchw.shape
    S = w_reduce.shape[0]
    HW = H * W
    itemsize = jnp.dtype(x_nchw.dtype).itemsize

    # Free reshape: NCHW -> (N, C, HW).  No transposes anywhere.
    x = x_nchw.reshape(N, C, HW)

    # Weights stay in their natural PyTorch layouts, f32.
    w1 = jnp.asarray(w_reduce, jnp.float32)                # (S, C)
    w2 = jnp.asarray(w_expand, jnp.float32)                # (C, S)
    b1 = jnp.asarray(b_reduce, jnp.float32).reshape(1, S)  # (1, S)
    b2 = jnp.asarray(b_expand, jnp.float32).reshape(1, C)  # (1, C)

    vmem_cap, num_tc = _chip_info()
    # v7x (64 MiB): ~48 MiB limit; v5e/v6e (128 MiB): ~96 MiB limit.
    vmem_limit = int(min(vmem_cap * 3 // 4, vmem_cap - (8 << 20)))
    weight_bytes = (2 * S * C + S + C) * 4
    budget = vmem_limit - weight_bytes - (1 << 20)         # DMA/temp slack
    # Pipelined footprint per block: ~2x in + 2x out (double buffers) + temps.
    per_batch_bytes = C * HW * itemsize
    target_block_bytes = int(min(8 << 20, max(2 << 20, budget // 5)))

    use_mxu = (C >= 256) and (S >= 16)
    use_tiled = force_tiled or (5 * per_batch_bytes > budget)

    if not use_tiled:
        # ---------------- fused single-pass path ----------------
        nb = _pick_batch_block(N, per_batch_bytes, target_block_bytes, num_tc)
        grid = (pl.cdiv(N, nb),)
        cost = pl.CostEstimate(
            flops=3 * N * C * HW + 4 * N * C * S,          # mem-bound op
            transcendentals=N * (S + C),                   # sigmoid / SiLU
            bytes_accessed=2 * N * C * HW * itemsize + weight_bytes,
        )
        out = pl.pallas_call(
            functools.partial(_se_fused_kernel, use_mxu=use_mxu),
            out_shape=jax.ShapeDtypeStruct((N, C, HW), x.dtype),
            grid_spec=pltpu.PrefetchScalarGridSpec(
                num_scalar_prefetch=0,
                grid=grid,
                in_specs=[
                    # last two block dims (C, HW) equal the full array dims
                    pl.BlockSpec((nb, C, HW), lambda n: (n, 0, 0)),
                    pl.BlockSpec((S, C), lambda n: (0, 0)),
                    pl.BlockSpec((1, S), lambda n: (0, 0)),
                    pl.BlockSpec((C, S), lambda n: (0, 0)),
                    pl.BlockSpec((1, C), lambda n: (0, 0)),
                ],
                out_specs=pl.BlockSpec((nb, C, HW), lambda n: (n, 0, 0)),
            ),
            compiler_params=pltpu.CompilerParams(
                dimension_semantics=("parallel",),
                vmem_limit_bytes=vmem_limit,
            ),
            cost_estimate=cost,
        )(x, w1, b1, w2, b2)
        return out.reshape(N, C, H, W)

    # ---------------- HW-tiled two-pass fallback (large feature maps) -------
    # Batch block: full N when small, else a multiple of 8 (layout constraint
    # on the (nb, C) means blocks).
    if N <= 8:
        nb2 = N
    else:
        desired = max(1, target_block_bytes // max(C * 128 * itemsize, 1))
        nb2 = min(N, max(8, (desired // 8) * 8))

    if hw_tile is None:
        row_bytes = nb2 * C * itemsize
        hw_tile = max(128, (target_block_bytes // max(row_bytes, 1)) // 128 * 128)
    hw_tile = int(min(hw_tile, pl.cdiv(HW, 128) * 128))
    hw_steps = pl.cdiv(HW, hw_tile)
    nb_steps = pl.cdiv(N, nb2)

    # Pass 1: spatial means (N, C) in f32 (x read once).
    means = pl.pallas_call(
        functools.partial(_mean_kernel, hw_total=HW, hw_tile=hw_tile),
        out_shape=jax.ShapeDtypeStruct((N, C), jnp.float32),
        grid_spec=pltpu.PrefetchScalarGridSpec(
            num_scalar_prefetch=0,
            grid=(nb_steps, hw_steps),
            in_specs=[pl.BlockSpec((nb2, C, hw_tile), lambda n, h: (n, 0, h))],
            out_specs=pl.BlockSpec((nb2, C), lambda n, h: (n, 0)),
        ),
        compiler_params=pltpu.CompilerParams(
            dimension_semantics=("parallel", "arbitrary"),
            vmem_limit_bytes=vmem_limit,
        ),
    )(x)

    # Pass 2: gate + excite multiply, streamed over HW tiles (x read again).
    out = pl.pallas_call(
        functools.partial(_scale_kernel, use_mxu=use_mxu),
        out_shape=jax.ShapeDtypeStruct((N, C, HW), x.dtype),
        grid_spec=pltpu.PrefetchScalarGridSpec(
            num_scalar_prefetch=0,
            grid=(nb_steps, hw_steps),
            in_specs=[
                pl.BlockSpec((nb2, C), lambda n, h: (n, 0)),
                pl.BlockSpec((S, C), lambda n, h: (0, 0)),
                pl.BlockSpec((1, S), lambda n, h: (0, 0)),
                pl.BlockSpec((C, S), lambda n, h: (0, 0)),
                pl.BlockSpec((1, C), lambda n, h: (0, 0)),
                pl.BlockSpec((nb2, C, hw_tile), lambda n, h: (n, 0, h)),
            ],
            out_specs=pl.BlockSpec((nb2, C, hw_tile), lambda n, h: (n, 0, h)),
        ),
        compiler_params=pltpu.CompilerParams(
            dimension_semantics=("parallel", "parallel"),
            vmem_limit_bytes=vmem_limit,
        ),
    )(means, w1, b1, w2, b2, x)

    return out.reshape(N, C, H, W)


# ---------------------------------------------------------------------------
# Reference & self-test
# ---------------------------------------------------------------------------

def squeeze_excite_ref(x, w1, b1, w2, b2):
    """Plain-JAX reference matching the PyTorch forward (NCHW)."""
    scale = jnp.mean(x, axis=(2, 3), keepdims=True)                     # (N,C,1,1)
    scale = jnp.einsum('ncij,sc->nsij', scale, w1) + b1[None, :, None, None]
    scale = scale * jax.nn.sigmoid(scale)                               # SiLU
    scale = jnp.einsum('nsij,cs->ncij', scale, w2) + b2[None, :, None, None]
    scale = jax.nn.sigmoid(scale)
    return scale * x


if __name__ == "__main__":
    # module config: input_c=64 -> squeeze_c = int(64 * 0.0625) = 4, expand_c=32
    input_c, expand_c = 64, 32
    squeeze_c = int(input_c * 0.0625)
    N, H, W = 2, 16, 16

    key = jax.random.PRNGKey(0)
    kx, k1, k2, k3, k4 = jax.random.split(key, 5)

    x = jax.random.normal(kx, (N, expand_c, H, W), dtype=jnp.float32)
    # Conv2d(expand_c, squeeze_c, 1) weight (squeeze_c, expand_c, 1, 1) -> drop kxk
    w_reduce = jax.random.normal(k1, (squeeze_c, expand_c), dtype=jnp.float32) * 0.1
    b_reduce = jax.random.normal(k2, (squeeze_c,), dtype=jnp.float32) * 0.1
    # Conv2d(squeeze_c, expand_c, 1) weight (expand_c, squeeze_c, 1, 1)
    w_expand = jax.random.normal(k3, (expand_c, squeeze_c), dtype=jnp.float32) * 0.1
    b_expand = jax.random.normal(k4, (expand_c,), dtype=jnp.float32) * 0.1

    ref = squeeze_excite_ref(x, w_reduce, b_reduce, w_expand, b_expand)

    # Fast fused single-pass path.
    out = jax.block_until_ready(
        squeeze_excite(x, w_reduce, b_reduce, w_expand, b_expand))
    assert out.shape == (N, expand_c, H, W)
    assert jnp.allclose(out, ref, atol=1e-5, rtol=1e-5), "fused path mismatch"

    # HW-tiled two-pass fallback (forced, 128-lane tiles -> 2 HW steps).
    out_tiled = jax.block_until_ready(
        squeeze_excite(x, w_reduce, b_reduce, w_expand, b_expand,
                       force_tiled=True, hw_tile=128))
    assert jnp.allclose(out_tiled, ref, atol=1e-5, rtol=1e-5), "tiled path mismatch"

    print("KERNEL_OK")
</pallas_src>

<mosaic_0001>
module attributes {stable_mosaic.version = 11 : i64} {
  func.func @_se_fused_kernel(%arg0: i32, %arg1: memref<2x32x256xf32, #tpu.memory_space<vmem>>, %arg2: memref<4x32xf32, #tpu.memory_space<vmem>>, %arg3: memref<1x4xf32, #tpu.memory_space<vmem>>, %arg4: memref<32x4xf32, #tpu.memory_space<vmem>>, %arg5: memref<1x32xf32, #tpu.memory_space<vmem>>, %arg6: memref<2x32x256xf32, #tpu.memory_space<vmem>>) attributes {dimension_semantics = [#tpu.dimension_semantics<parallel>], iteration_bounds = array<i64: 1>, scalar_prefetch = 0 : i64, scratch_operands = 0 : i64, tpu.core_type = #tpu.core_type<tc>, window_params = [{transform_indices = @transform_0, window_bounds = array<i64: 2, 32, 256>}, {pipeline_mode = #tpu.pipeline_mode<synchronous>, transform_indices = @transform_1, window_bounds = array<i64: 4, 32>}, {pipeline_mode = #tpu.pipeline_mode<synchronous>, transform_indices = @transform_2, window_bounds = array<i64: 1, 4>}, {pipeline_mode = #tpu.pipeline_mode<synchronous>, transform_indices = @transform_3, window_bounds = array<i64: 32, 4>}, {pipeline_mode = #tpu.pipeline_mode<synchronous>, transform_indices = @transform_4, window_bounds = array<i64: 1, 32>}, {transform_indices = @transform_5, window_bounds = array<i64: 2, 32, 256>}]} {
    %c0 = arith.constant 0 : index
    %c0_0 = arith.constant 0 : index
    %c0_1 = arith.constant 0 : index
    %0 = vector.load %arg1[%c0, %c0_0, %c0_1] : memref<2x32x256xf32, #tpu.memory_space<vmem>>, vector<2x32x256xf32>
    %cst = arith.constant dense<0.000000e+00> : vector<2x32xf32>
    %1 = vector.multi_reduction <add>, %0, %cst [2] : vector<2x32x256xf32> to vector<2x32xf32>
    %cst_2 = arith.constant 3.906250e-03 : f32
    %2 = vector.broadcast %cst_2 : f32 to vector<2x32xf32>
    %3 = arith.mulf %1, %2 : vector<2x32xf32>
    %c0_3 = arith.constant 0 : index
    %c0_4 = arith.constant 0 : index
    %4 = vector.load %arg2[%c0_3, %c0_4] : memref<4x32xf32, #tpu.memory_space<vmem>>, vector<4x32xf32>
    %c0_5 = arith.constant 0 : index
    %c0_6 = arith.constant 0 : index
    %5 = vector.load %arg3[%c0_5, %c0_6] : memref<1x4xf32, #tpu.memory_space<vmem>>, vector<1x4xf32>
    %c0_7 = arith.constant 0 : index
    %c0_8 = arith.constant 0 : index
    %6 = vector.load %arg4[%c0_7, %c0_8] : memref<32x4xf32, #tpu.memory_space<vmem>>, vector<32x4xf32>
    %c0_9 = arith.constant 0 : index
    %c0_10 = arith.constant 0 : index
    %7 = vector.load %arg5[%c0_9, %c0_10] : memref<1x32xf32, #tpu.memory_space<vmem>>, vector<1x32xf32>
    %8 = vector.shape_cast %3 : vector<2x32xf32> to vector<2x1x32xf32>
    %9 = vector.shape_cast %4 : vector<4x32xf32> to vector<1x4x32xf32>
    %10 = vector.broadcast %8 : vector<2x1x32xf32> to vector<2x4x32xf32>
    %11 = vector.broadcast %9 : vector<1x4x32xf32> to vector<2x4x32xf32>
    %12 = arith.mulf %10, %11 : vector<2x4x32xf32>
    %cst_11 = arith.constant dense<0.000000e+00> : vector<2x4xf32>
    %13 = vector.multi_reduction <add>, %12, %cst_11 [2] : vector<2x4x32xf32> to vector<2x4xf32>
    %14 = vector.broadcast %5 : vector<1x4xf32> to vector<2x4xf32>
    %15 = arith.addf %13, %14 : vector<2x4xf32>
    %16 = arith.negf %15 : vector<2x4xf32>
    %17 = math.exp %16 : vector<2x4xf32>
    %cst_12 = arith.constant 1.000000e+00 : f32
    %18 = vector.broadcast %cst_12 : f32 to vector<2x4xf32>
    %19 = arith.addf %18, %17 : vector<2x4xf32>
    %20 = arith.divf %18, %19 : vector<2x4xf32>
    %21 = arith.mulf %15, %20 : vector<2x4xf32>
    %22 = vector.shape_cast %21 : vector<2x4xf32> to vector<2x1x4xf32>
    %23 = vector.shape_cast %6 : vector<32x4xf32> to vector<1x32x4xf32>
    %24 = vector.broadcast %22 : vector<2x1x4xf32> to vector<2x32x4xf32>
    %25 = vector.broadcast %23 : vector<1x32x4xf32> to vector<2x32x4xf32>
    %26 = arith.mulf %24, %25 : vector<2x32x4xf32>
    %cst_13 = arith.constant dense<0.000000e+00> : vector<2x32xf32>
    %27 = vector.multi_reduction <add>, %26, %cst_13 [2] : vector<2x32x4xf32> to vector<2x32xf32>
    %28 = vector.broadcast %7 : vector<1x32xf32> to vector<2x32xf32>
    %29 = arith.addf %27, %28 : vector<2x32xf32>
    %30 = arith.negf %29 : vector<2x32xf32>
    %31 = math.exp %30 : vector<2x32xf32>
    %cst_14 = arith.constant 1.000000e+00 : f32
    %32 = vector.broadcast %cst_14 : f32 to vector<2x32xf32>
    %33 = arith.addf %32, %31 : vector<2x32xf32>
    %34 = arith.divf %32, %33 : vector<2x32xf32>
    %35 = vector.shape_cast %34 : vector<2x32xf32> to vector<2x32x1xf32>
    %36 = vector.broadcast %35 : vector<2x32x1xf32> to vector<2x32x256xf32>
    %37 = arith.mulf %0, %36 : vector<2x32x256xf32>
    %c0_15 = arith.constant 0 : index
    %c0_16 = arith.constant 0 : index
    %c0_17 = arith.constant 0 : index
    %38 = vector.load %arg6[%c0_15, %c0_16, %c0_17] : memref<2x32x256xf32, #tpu.memory_space<vmem>>, vector<2x32x256xf32>
    tpu.vector_store %arg6[%c0_15, %c0_16, %c0_17], %37 {strides = array<i32>} : memref<2x32x256xf32, #tpu.memory_space<vmem>>, vector<2x32x256xf32>,
    return
  }
  func.func @transform_0(%arg0: i32) -> (i32, i32, i32) {
    %c0_i32 = arith.constant 0 : i32
    %c0_i32_0 = arith.constant 0 : i32
    %c0_i32_1 = arith.constant 0 : i32
    return %arg0, %c0_i32, %c0_i32_0 : i32, i32, i32
  }
  func.func @transform_1(%arg0: i32) -> (i32, i32) {
    %c0_i32 = arith.constant 0 : i32
    %c0_i32_0 = arith.constant 0 : i32
    %c0_i32_1 = arith.constant 0 : i32
    return %c0_i32, %c0_i32_0 : i32, i32
  }
  func.func @transform_2(%arg0: i32) -> (i32, i32) {
    %c0_i32 = arith.constant 0 : i32
    %c0_i32_0 = arith.constant 0 : i32
    %c0_i32_1 = arith.constant 0 : i32
    return %c0_i32, %c0_i32_0 : i32, i32
  }
  func.func @transform_3(%arg0: i32) -> (i32, i32) {
    %c0_i32 = arith.constant 0 : i32
    %c0_i32_0 = arith.constant 0 : i32
    %c0_i32_1 = arith.constant 0 : i32
    return %c0_i32, %c0_i32_0 : i32, i32
  }
  func.func @transform_4(%arg0: i32) -> (i32, i32) {
    %c0_i32 = arith.constant 0 : i32
    %c0_i32_0 = arith.constant 0 : i32
    %c0_i32_1 = arith.constant 0 : i32
    return %c0_i32, %c0_i32_0 : i32, i32
  }
  func.func @transform_5(%arg0: i32) -> (i32, i32, i32) {
    %c0_i32 = arith.constant 0 : i32
    %c0_i32_0 = arith.constant 0 : i32
    %c0_i32_1 = arith.constant 0 : i32
    return %arg0, %c0_i32, %c0_i32_0 : i32, i32, i32
  }
}

</mosaic_0001>

<bundles_post_ra>
// kernel: tpu_custom_call.1
= control target key start
LH: loop header
LB: loop body
LE: loop exit
PB: predicated region body
PF: predicated region fallthrough
CT: control target
= control target key end

     0   :  { %10 = vsyncpa [#allocation3], 0  ;;  %s2309_s0 = inlined_call_operand.hbm [shape: f32[2,32,256], index: 0, kind: input, shape index: {}]   ;;  %s2310_s1 = inlined_call_operand.vmem [shape: f32[4,32], index: 1, kind: input, shape index: {}]   ;;  %s2311_s2 = inlined_call_operand.vmem [shape: f32[1,4], index: 2, kind: input, shape index: {}]   ;;  %s2312_s3 = inlined_call_operand.vmem [shape: f32[32,4], index: 3, kind: input, shape index: {}]   ;;  %s2313_s4 = inlined_call_operand.vmem [shape: f32[1,32], index: 4, kind: input, shape index: {}]   ;;  %s2314_s5 = inlined_call_operand.hbm [shape: f32[2,32,256], index: 5, kind: output, shape index: {}]  }
   0x1   :  { %11 = vsyncpa [#allocation4], 0  ;;  %s16_s20 = sshll.u32 %s2309_s0, 4  ;;  %s1676_s21 = smov [#allocation2]   ;;  %s17_s20 = int_to_ptr.hbm [resolvable:$true] %s16_s20 }
   0x2   :  { %s18_s22 = sshll.u32 %s1676_s21, 4  ;;  %s1677_s23 = smov 256   ;;  %s19_s22 = int_to_ptr.vmem [resolvable:$true] %s18_s22 }
   0x3   :  { %s1678_s24 = smov 16  }
   0x4   :  { %24 = dma.hbm_to_vmem [thread:$0]  %s17_s20, 2048, %s19_s22, [#allocation3], %s1677_s23, %s1677_s23, %s1678_s24  }
   0x5   :  { %1672 = dma.done.wait [#allocation3], 2048  }
   0x6   :  { %1673 = vsyncadd [#allocation3], 4294965248  ;;  %v94_v0 = vlaneseq  ;;  %v45_v2 = vld [vmem:[#allocation2 + $0x40] sm:$0xff]  ;;  %v46_v3 = vld [vmem:[#allocation2 + $0x48] sm:$0xff]  ;;  %v1679_v34 = vmov 0   ;;  %vm374_vm0 = vcmask 130112  }
   0x7   :  { %v41_v4 = vld [vmem:[#allocation2 + $0x20] sm:$0xff]  ;;  %v65_v5 = vadd.f32 %v46_v3, %v45_v2  ;;  %v42_v6 = vld [vmem:[#allocation2 + $0x28] sm:$0xff]  ;;  %v47_v11 = vld [vmem:[#allocation2 + $0x50] sm:$0xff]  ;;  %vm378_vm1 = vcmask 195712   ;;  %vm382_vm2 = vcmask 261312   ;;  %vm433_vm3 = vcmask 1041409  }
   0x8   :  { %v1718_v1 = vshrl.u32 %v94_v0, 7  ;;  %v37_v7 = vld [vmem:[#allocation2] sm:$0xff]  ;;  %v38_v8 = vld [vmem:[#allocation2 + $0x8] sm:$0xff]  ;;  %v59_v9 = vadd.f32 %v42_v6, %v41_v4  ;;  %v48_v13 = vld [vmem:[#allocation2 + $0x58] sm:$0xff]  ;;  %vm435_vm4 = vcmask 1042434   ;;  %vm437_vm5 = vcmask 1043459  }
   0x9   :  { %v53_v10 = vadd.f32 %v38_v8, %v37_v7  ;;  %66 = vadd.xlane.f32.xlu2 %v65_v5  ;;  %v43_v14 = vld [vmem:[#allocation2 + $0x30] sm:$0xff]  ;;  %v44_v15 = vld [vmem:[#allocation2 + $0x38] sm:$0xff]  ;;  %v68_v18 = vadd.f32 %v48_v13, %v47_v11  ;;  %v49_v23 = vld [vmem:[#allocation2 + $0x60] sm:$0xff]  ;;  %vm444_vm6 = vcmask 257024   ;;  %vm1149_vm15 = vcmask 1044484   ;;  %s1507_s13 = sshll.u32 %s2314_s5, 4  ;;  %s1508_s13 = int_to_ptr.hbm [resolvable:$true] %s1507_s13 }
   0xa   :  { %1535 = vset.pattern.permute.xlu2 %v1718_v1  ;;  %1542 = vset.pattern.permute.xlu0 %v1718_v1  ;;  %v1723_v12 = vadd.s32 16, %v1718_v1  ;;  %v39_v16 = vld [vmem:[#allocation2 + $0x10] sm:$0xff]  ;;  %v40_v17 = vld [vmem:[#allocation2 + $0x18] sm:$0xff]  ;;  %v62_v19 = vadd.f32 %v44_v15, %v43_v14  ;;  %v50_v24 = vld [vmem:[#allocation2 + $0x68] sm:$0xff]  ;;  %v1730_v30 = vadd.s32 24, %v1718_v1  ;;  %v1734_v31 = vadd.s32 8, %v1718_v1 }
   0xb   :  { %60 = vadd.xlane.f32.xlu1 %v59_v9  ;;  %54 = vadd.xlane.f32.xlu0 %v53_v10  ;;  %v56_v20 = vadd.f32 %v40_v17, %v39_v16  ;;  %v51_v21 = vld [vmem:[#allocation2 + $0x70] sm:$0xff]  ;;  %v52_v22 = vld [vmem:[#allocation2 + $0x78] sm:$0xff]  ;;  %v71_v26 = vadd.f32 %v50_v24, %v49_v23  ;;  %v85_v27 = vld [vmem:[%s2310_s1] sm:$0xf] }
   0xc   :  { %1536 = vset.pattern.permute.xlu1 %v1723_v12  ;;  %v74_v25 = vadd.f32 %v52_v22, %v51_v21  ;;  %v93_v28 = vperm.slane %v85_v27, 0  ;;  %v143_v29 = vperm.slane %v85_v27, 2  ;;  %v118_v32 = vperm.slane %v85_v27, 1 }
   0xd   :  { %v168_v33 = vperm.slane %v85_v27, 3 }
  0x11   :  { %69 = vadd.xlane.f32.xlu2 %v68_v18 }
  0x13   :  { %63 = vadd.xlane.f32.xlu1 %v62_v19  ;;  %57 = vadd.xlane.f32.xlu0 %v56_v20 }
  0x1b   :  { %75 = vadd.xlane.f32.xlu1 %v74_v25  ;;  %72 = vadd.xlane.f32.xlu0 %v71_v26 }
  0x29   :  { %98 = vperm.xlu2 %1535, %v93_v28  }
  0x2f   :  { %148 = vperm.xlu0 %1542, %v143_v29  }
  0x31   :  { %1537 = vset.pattern.permute.xlu2 %v1730_v30 }
  0x34   :  { %110 = vperm.xlu1 %1536, %v93_v28  }
  0x37   :  { %1543 = vset.pattern.permute.xlu0 %v1734_v31 }
  0x39   :  { %116 = vperm.xlu2 %1537, %v93_v28  }
  0x3c   :  { %1539 = vset.pattern.permute.xlu1 %v1734_v31 }
  0x3f   :  { %104 = vperm.xlu0 %1543, %v93_v28  }
  0x41   :  { %1538 = vset.pattern.permute.xlu2 %v1718_v1 }
  0x44   :  { %129 = vperm.xlu1 %1539, %v118_v32  }
  0x47   :  { %179 = vperm.xlu0 %1543, %v168_v33  }
  0x49   :  { %123 = vperm.xlu2 %1538, %v118_v32  }
  0x4c   :  { %1541 = vset.pattern.permute.xlu1 %v1730_v30 }
  0x4f   :  { %1552 = vset.pattern.permute.xlu0 %v1679_v34 }
  0x51   :  { %1540 = vset.pattern.permute.xlu2 %v1723_v12 }
  0x54   :  { %141 = vperm.xlu1 %1541, %v118_v32  }
  0x59   :  { %135 = vperm.xlu2 %1540, %v118_v32  }
  0x5c   :  { %1545 = vset.pattern.permute.xlu1 %v1723_v12 }
  0x61   :  { %1544 = vset.pattern.permute.xlu2 %v1734_v31 }
  0x64   :  { %160 = vperm.xlu1 %1545, %v143_v29  }
  0x69   :  { %154 = vperm.xlu2 %1544, %v143_v29  }
  0x6c   :  { %1547 = vset.pattern.permute.xlu1 %v1718_v1 }
  0x71   :  { %1546 = vset.pattern.permute.xlu2 %v1730_v30 }
  0x74   :  { %173 = vperm.xlu1 %1547, %v168_v33  }
  0x79   :  { %166 = vperm.xlu2 %1546, %v143_v29  }
  0x7c   :  { %1549 = vset.pattern.permute.xlu1 %v1730_v30  ;;  %v67_v35 = vpop.xlane.xlu2 %66 }
  0x7d   :  { %v81_v8 = vmul.f32 0.00390625, %v67_v35 }
  0x7e   :  { %v55_v36 = vpop.xlane.xlu0 %54  ;;  %v61_v38 = vpop.xlane.xlu1 %60 }
  0x7f   :  { %v77_v39 = vmul.f32 0.00390625, %v55_v36  ;;  %v79_v50 = vmul.f32 0.00390625, %v61_v38  ;;  %v87_v38 = vld [vmem:[%s2312_s3] sm:$0xff] }
  0x81   :  { %1548 = vset.pattern.permute.xlu2 %v1723_v12 }
  0x84   :  { %191 = vperm.xlu1 %1549, %v168_v33   ;;  %v70_v37 = vpop.xlane.xlu2 %69 }
  0x85   :  { %v82_v15 = vmul.f32 0.00390625, %v70_v37 }
  0x86   :  { %v58_v40 = vpop.xlane.xlu0 %57  ;;  %v64_v43 = vpop.xlane.xlu1 %63 }
  0x87   :  { %v80_v54 = vmul.f32 0.00390625, %v64_v43  ;;  %v78_v56 = vmul.f32 0.00390625, %v58_v40  ;;  %v1566_v40 = vld [vmem:[%s2311_s2] ss:$0 sm:$0xff] }
  0x89   :  { %185 = vperm.xlu2 %1548, %v168_v33  }
  0x8c   :  { %1551 = vset.pattern.permute.xlu1 %v1679_v34  ;;  %v99_v41 = vpop.permute.xlu2 %98 }
  0x8d   :  { %v209_v42 = vmul.f32 %v99_v41, %v77_v39  ;;  %v225_v13 = vmul.f32 %v99_v41, %v81_v8 }
  0x8e   :  { %v73_v44 = vpop.xlane.xlu0 %72  ;;  %v76_v46 = vpop.xlane.xlu1 %75 }
  0x8f   :  { %v84_v16 = vmul.f32 0.00390625, %v76_v46  ;;  %v83_v20 = vmul.f32 0.00390625, %v73_v44  ;;  %v506_v44 = vperm.slane %v87_v38, 0 }
  0x91   :  { %1550 = vset.pattern.permute.xlu2 %v1679_v34 }
  0x92   :  { %274 = vperm.xlu2 %1550, %v209_v42   ;;  %v1772_v42 = vld [vmem:[%s2312_s3 + $0x8] sm:$0xff] }
  0x93   :  { %v562_v43 = vperm.slane %v1772_v42, 0  ;;  %v583_v46 = vperm.slane %v1772_v42, 3 }
  0x94   :  { %v117_v45 = vpop.permute.xlu2 %116 }
  0x95   :  { %v212_v55 = vmul.f32 %v117_v45, %v80_v54  ;;  %v228_v18 = vmul.f32 %v117_v45, %v84_v16 }
  0xa1   :  { %v1750_v47 = vpop.permute.xlu0 %148 }
  0xa2   :  { %v217_v48 = vmul.f32 %v1750_v47, %v77_v39  ;;  %v233_v41 = vmul.f32 %v1750_v47, %v81_v8 }
  0xa3   :  { %v124_v49 = vpop.permute.xlu2 %123 }
  0xa4   :  { %298 = vperm.xlu2 %1550, %v217_v48   ;;  %v213_v51 = vmul.f32 %v124_v49, %v77_v39  ;;  %v229_v21 = vmul.f32 %v124_v49, %v81_v8  ;;  %v513_v48 = vperm.slane %v87_v38, 1  ;;  %v520_v49 = vperm.slane %v87_v38, 2 }
  0xa6   :  { %v1753_v52 = vpop.permute.xlu1 %110  ;;  %286 = vperm.xlu1 %1551, %v213_v51  }
  0xa7   :  { %v211_v53 = vmul.f32 %v1753_v52, %v79_v50  ;;  %v227_v35 = vmul.f32 %v1753_v52, %v83_v20  ;;  %v548_v52 = vperm.slane %v87_v38, 6 }
  0xa9   :  { %280 = vperm.xlu0 %1552, %v211_v53   ;;  %v534_v53 = vperm.slane %v87_v38, 4 }
  0xac   :  { %283 = vperm.xlu2 %1550, %v212_v55  }
  0xb1   :  { %v105_v63 = vpop.permute.xlu0 %104 }
  0xb2   :  { %v226_v17 = vmul.f32 %v105_v63, %v82_v15  ;;  %v210_v19 = vmul.f32 %v105_v63, %v78_v56 }
  0xb3   :  { %v136_v59 = vpop.permute.xlu2 %135 }
  0xb4   :  { %v215_v22 = vmul.f32 %v136_v59, %v79_v50  ;;  %v231_v23 = vmul.f32 %v136_v59, %v83_v20 }
  0xb6   :  { %v130_v57 = vpop.permute.xlu1 %129 }
  0xb7   :  { %v214_v58 = vmul.f32 %v130_v57, %v78_v56  ;;  %v230_v37 = vmul.f32 %v130_v57, %v82_v15  ;;  %v569_v57 = vperm.slane %v1772_v42, 1 }
  0xb9   :  { %289 = vperm.xlu2 %1550, %v214_v58   ;;  %v180_v6 = vpop.permute.xlu0 %179 }
  0xba   :  { %v222_v7 = vmul.f32 %v180_v6, %v78_v56  ;;  %v238_v33 = vmul.f32 %v180_v6, %v82_v15 }
  0xc3   :  { %v155_v62 = vpop.permute.xlu2 %154 }
  0xc4   :  { %v218_v25 = vmul.f32 %v155_v62, %v78_v56  ;;  %v234_v26 = vmul.f32 %v155_v62, %v82_v15  ;;  %v555_v56 = vperm.slane %v87_v38, 7 }
  0xc6   :  { %v142_v60 = vpop.permute.xlu1 %141 }
  0xc7   :  { %v216_v61 = vmul.f32 %v142_v60, %v80_v54  ;;  %v232_v24 = vmul.f32 %v142_v60, %v84_v16  ;;  %v576_v60 = vperm.slane %v1772_v42, 2 }
  0xc9   :  { %295 = vperm.xlu0 %1552, %v216_v61   ;;  %v590_v61 = vperm.slane %v1772_v42, 4 }
  0xd3   :  { %v1756_v2 = vpop.permute.xlu2 %166 }
  0xd4   :  { %v220_v3 = vmul.f32 %v1756_v2, %v80_v54  ;;  %v236_v45 = vmul.f32 %v1756_v2, %v84_v16 }
  0xd6   :  { %v161_v4 = vpop.permute.xlu1 %160  ;;  %307 = vperm.xlu2 %1550, %v220_v3   ;;  %v597_v3 = vperm.slane %v1772_v42, 5 }
  0xd7   :  { %v219_v5 = vmul.f32 %v161_v4, %v79_v50  ;;  %v235_v28 = vmul.f32 %v161_v4, %v83_v20 }
  0xd9   :  { %304 = vperm.xlu0 %1552, %v219_v5   ;;  %v1785_v5 = vld [vmem:[%s2312_s3 + $0x10] sm:$0xff] }
  0xe1   :  { %313 = vperm.xlu0 %1552, %v222_v7   ;;  %v618_v7 = vperm.slane %v1785_v5, 0 }
  0xe3   :  { %v186_v9 = vpop.permute.xlu2 %185 }
  0xe4   :  { %v223_v10 = vmul.f32 %v186_v9, %v79_v50  ;;  %v239_v47 = vmul.f32 %v186_v9, %v83_v20  ;;  %v541_v50 = vperm.slane %v87_v38, 5 }
  0xe6   :  { %v174_v11 = vpop.permute.xlu1 %173  ;;  %316 = vperm.xlu2 %1550, %v223_v10  }
  0xe7   :  { %v221_v14 = vmul.f32 %v174_v11, %v77_v39  ;;  %v237_v29 = vmul.f32 %v174_v11, %v81_v8  ;;  %v527_v39 = vperm.slane %v87_v38, 3  ;;  %v1789_v11 = vand.u32 127, %v94_v0 }
  0xe9   :  { %310 = vperm.xlu1 %1551, %v221_v14   ;;  %322 = vperm.xlu0 %1552, %v225_v13   ;;  %v639_v13 = vperm.slane %v1785_v5, 3  ;;  %v1793_v15 = vadd.s32 4294967288, %v1789_v11 }
  0xec   :  { %v275_v51 = vpop.permute.xlu2 %274 }
  0xee   :  { %325 = vperm.xlu2 %1550, %v226_v17  }
  0xf1   :  { %277 = vperm.xlu1 %1551, %v210_v19   ;;  %331 = vperm.xlu0 %1552, %v228_v18   ;;  %v1799_v18 = vadd.s32 4294967280, %v1789_v11 }
  0xf6   :  { %334 = vperm.xlu2 %1550, %v229_v21   ;;  %v192_v27 = vpop.permute.xlu1 %191 }
  0xf7   :  { %v224_v32 = vmul.f32 %v192_v27, %v80_v54  ;;  %v240_v36 = vmul.f32 %v192_v27, %v84_v16  ;;  %v660_v27 = vperm.slane %v1785_v5, 6 }
  0xf9   :  { %292 = vperm.xlu1 %1551, %v215_v22   ;;  %340 = vperm.xlu0 %1552, %v231_v23   ;;  %v371_v22 = vperm.slane %v275_v51, %v1789_v11 }
  0xfe   :  { %343 = vperm.xlu2 %1550, %v232_v24   ;;  %v299_v54 = vpop.permute.xlu2 %298 }
  0xff   :  { %v391_v23 = vperm.slane %v299_v54, %v1789_v11 }
 0x101   :  { %301 = vperm.xlu1 %1551, %v218_v25   ;;  %349 = vperm.xlu0 %1552, %v234_v26   ;;  %v1808_v25 = vadd.s32 4294967272, %v1789_v11 }
 0x106   :  { %352 = vperm.xlu2 %1550, %v235_v28   ;;  %v284_v62 = vpop.permute.xlu2 %283 }
 0x109   :  { %319 = vperm.xlu1 %1551, %v224_v32   ;;  %358 = vperm.xlu0 %1552, %v237_v29  }
 0x10e   :  { %361 = vperm.xlu2 %1550, %v238_v33  }
 0x111   :  { %328 = vperm.xlu1 %1551, %v227_v35   ;;  %367 = vperm.xlu0 %1552, %v240_v36  }
 0x113   :  { %v290_v4 = vpop.permute.xlu2 %289 }
 0x114   :  { %v385_v0 = vperm.slane %v290_v4, %v1793_v15 }
 0x116   :  { %1554 = vset.pattern.permute.xlu2 %v1718_v1 }
 0x118   :  { %v287_v58 = vpop.permute.xlu1 %286 }
 0x119   :  { %337 = vperm.xlu1 %1551, %v230_v37   ;;  %1553 = vset.pattern.permute.xlu0 %v1718_v1  ;;  %v384_v17 = vperm.slane %v287_v58, %v1789_v11 }
 0x11b   :  { %v281_v55 = vpop.permute.xlu0 %280  ;;  %v386_v26 = vsel %vm374_vm0, %v385_v0, %v384_v17 }
 0x11c   :  { %v377_v35 = vperm.slane %v281_v55, %v1799_v18 }
 0x11e   :  { %532 = vperm.xlu2 %1554, %v527_v39  }
 0x121   :  { %346 = vperm.xlu1 %1551, %v233_v41   ;;  %457 = vperm.xlu0 %1553, %v1566_v40  }
 0x126   :  { %567 = vperm.xlu2 %1554, %v562_v43  }
 0x129   :  { %355 = vperm.xlu1 %1551, %v236_v45   ;;  %511 = vperm.xlu0 %1553, %v506_v44   ;;  %v381_v44 = vperm.slane %v284_v62, %v1808_v25 }
 0x12e   :  { %588 = vperm.xlu2 %1554, %v583_v46  }
 0x130   :  { %v308_v8 = vpop.permute.xlu2 %307 }
 0x131   :  { %364 = vperm.xlu1 %1551, %v239_v47   ;;  %518 = vperm.xlu0 %1553, %v513_v48   ;;  %v396_v41 = vperm.slane %v308_v8, %v1808_v25  ;;  %v1833_v47 = vld [vmem:[%s2312_s3 + $0x18] sm:$0xff] }
 0x132   :  { %v681_v54 = vperm.slane %v1833_v47, 1 }
 0x139   :  { %525 = vperm.xlu0 %1553, %v520_v49   ;;  %1555 = vset.pattern.permute.xlu1 %v1718_v1 }
 0x13b   :  { %v296_v59 = vpop.permute.xlu0 %295 }
 0x13c   :  { %v389_v37 = vperm.slane %v296_v59, %v1808_v25 }
 0x140   :  { %v317_v14 = vpop.permute.xlu2 %316 }
 0x141   :  { %546 = vperm.xlu0 %1553, %v541_v50   ;;  %539 = vperm.xlu1 %1555, %v534_v53   ;;  %v401_v49 = vperm.slane %v317_v14, %v1799_v18 }
 0x148   :  { %v1819_v38 = vpop.permute.xlu2 %325 }
 0x149   :  { %553 = vperm.xlu0 %1553, %v548_v52   ;;  %574 = vperm.xlu1 %1555, %v569_v57  }
 0x14b   :  { %v305_v2 = vpop.permute.xlu0 %304 }
 0x14c   :  { %v394_v28 = vperm.slane %v305_v2, %v1799_v18  ;;  %v702_v2 = vperm.slane %v1833_v47, 4 }
 0x151   :  { %560 = vperm.xlu0 %1553, %v555_v56   ;;  %595 = vperm.xlu1 %1555, %v590_v61   ;;  %v335_v61 = vpop.permute.xlu2 %334 }
 0x152   :  { %v412_v17 = vperm.slane %v335_v61, %v1789_v11  ;;  %v632_v61 = vperm.slane %v1785_v5, 2 }
 0x153   :  { %v314_v9 = vpop.permute.xlu0 %313 }
 0x154   :  { %v399_v39 = vperm.slane %v314_v9, %v1793_v15  ;;  %v604_v9 = vperm.slane %v1772_v42, 6 }
 0x159   :  { %581 = vperm.xlu0 %1553, %v576_v60   ;;  %v344_v4 = vpop.permute.xlu2 %343 }
 0x15b   :  { %v311_v63 = vpop.permute.xlu1 %310  ;;  %v1795_v16 = vpop.permute.xlu0 %322 }
 0x15c   :  { %v398_v29 = vperm.slane %v311_v63, %v1789_v11 }
 0x15e   :  { %v400_v45 = vsel %vm374_vm0, %v399_v39, %v398_v29 }
 0x15f   :  { %v402_v55 = vsel %vm378_vm1, %v401_v49, %v400_v45 }
 0x161   :  { %602 = vperm.xlu0 %1553, %v597_v3  }
 0x163   :  { %v278_v6 = vpop.permute.xlu1 %277  ;;  %v1827_v46 = vpop.permute.xlu0 %331 }
 0x164   :  { %v373_v19 = vperm.slane %v278_v6, %v1793_v15  ;;  %v723_v6 = vperm.slane %v1833_v47, 7 }
 0x166   :  { %v375_v32 = vsel %vm374_vm0, %v373_v19, %v371_v22  ;;  %v625_v22 = vperm.slane %v1785_v5, 1 }
 0x167   :  { %v379_v43 = vsel %vm378_vm1, %v377_v35, %v375_v32 }
 0x168   :  { %v383_v53 = vsel %vm382_vm2, %v381_v44, %v379_v43 }
 0x169   :  { %623 = vperm.xlu0 %1553, %v618_v7  }
 0x16b   :  { %v293_v10 = vpop.permute.xlu1 %292  ;;  %v341_v63 = vpop.permute.xlu0 %340 }
 0x16c   :  { %v387_v20 = vperm.slane %v293_v10, %v1799_v18  ;;  %v353_v10 = vpop.permute.xlu2 %352 }
 0x16e   :  { %v388_v36 = vsel %vm378_vm1, %v387_v20, %v386_v26  ;;  %v405_v20 = vperm.slane %v1795_v16, %v1789_v11 }
 0x16f   :  { %v390_v48 = vsel %vm382_vm2, %v389_v37, %v388_v36  ;;  %v422_v36 = vperm.slane %v353_v10, %v1799_v18 }
 0x170   :  { %v434_v56 = vsel %vm433_vm3, %v390_v48, %v383_v53  ;;  %v646_v53 = vperm.slane %v1785_v5, 4 }
 0x171   :  { %644 = vperm.xlu0 %1553, %v639_v13  }
 0x173   :  { %v302_v21 = vpop.permute.xlu1 %301  ;;  %v350_v7 = vpop.permute.xlu0 %349 }
 0x174   :  { %v392_v24 = vperm.slane %v302_v21, %v1793_v15 }
 0x176   :  { %v393_v33 = vsel %vm374_vm0, %v392_v24, %v391_v23  ;;  %v415_v23 = vperm.slane %v341_v63, %v1799_v18  ;;  %v420_v24 = vperm.slane %v350_v7, %v1793_v15  ;;  %v653_v63 = vperm.slane %v1785_v5, 5 }
 0x177   :  { %v395_v40 = vsel %vm378_vm1, %v394_v28, %v393_v33  ;;  %v362_v28 = vpop.permute.xlu2 %361  ;;  %v417_v33 = vperm.slane %v344_v4, %v1808_v25 }
 0x178   :  { %v397_v51 = vsel %vm382_vm2, %v396_v41, %v395_v40  ;;  %v427_v41 = vperm.slane %v362_v28, %v1793_v15 }
 0x179   :  { %665 = vperm.xlu0 %1553, %v660_v27   ;;  %v436_v58 = vsel %vm435_vm4, %v397_v51, %v434_v56  ;;  %v406_v27 = vperm.slane %v1819_v38, %v1793_v15  ;;  %v410_v38 = vperm.slane %v1827_v46, %v1808_v25 }
 0x17b   :  { %v320_v50 = vpop.permute.xlu1 %319  ;;  %v359_v13 = vpop.permute.xlu0 %358  ;;  %v407_v35 = vsel %vm374_vm0, %v406_v27, %v405_v20 }
 0x17c   :  { %v403_v52 = vperm.slane %v320_v50, %v1808_v25  ;;  %v426_v37 = vperm.slane %v359_v13, %v1789_v11 }
 0x17e   :  { %v404_v57 = vsel %vm382_vm2, %v403_v52, %v402_v55  ;;  %v428_v50 = vsel %vm374_vm0, %v427_v41, %v426_v37 }
 0x17f   :  { %v438_v59 = vsel %vm437_vm5, %v404_v57, %v436_v58  ;;  %v667_v57 = vperm.slane %v1785_v5, 7  ;;  %v709_v58 = vperm.slane %v1833_v47, 5  ;;  %v1899_v4 = vpop.permute.xlu2 %532 }
 0x180   :  { %v445_v60 = vsel %vm444_vm6, %v438_v59, 0.0  ;;  %v611_v59 = vperm.slane %v1772_v42, 7 }
 0x181   :  { %686 = vperm.xlu0 %1553, %v681_v54   ;;  %446 = vadd.xlane.f32.xlu2 %v445_v60 }
 0x183   :  { %v329_v62 = vpop.permute.xlu1 %328  ;;  %v368_v40 = vpop.permute.xlu0 %367 }
 0x184   :  { %v408_v26 = vperm.slane %v329_v62, %v1799_v18  ;;  %v431_v52 = vperm.slane %v368_v40, %v1808_v25 }
 0x186   :  { %v409_v39 = vsel %vm378_vm1, %v408_v26, %v407_v35 }
 0x187   :  { %v411_v51 = vsel %vm382_vm2, %v410_v38, %v409_v39  ;;  %v1904_v7 = vpop.permute.xlu2 %567 }
 0x189   :  { %707 = vperm.xlu0 %1553, %v702_v2  }
 0x18b   :  { %v338_v3 = vpop.permute.xlu1 %337 }
 0x18c   :  { %v413_v14 = vperm.slane %v338_v3, %v1793_v15  ;;  %v674_v3 = vperm.slane %v1833_v47, 0 }
 0x18e   :  { %v414_v21 = vsel %vm374_vm0, %v413_v14, %v412_v17 }
 0x18f   :  { %v416_v29 = vsel %vm378_vm1, %v415_v23, %v414_v21  ;;  %v1909_v5 = vpop.permute.xlu2 %588 }
 0x190   :  { %v418_v45 = vsel %vm382_vm2, %v417_v33, %v416_v29 }
 0x191   :  { %728 = vperm.xlu0 %1553, %v723_v6   ;;  %v439_v15 = vsel %vm433_vm3, %v418_v45, %v411_v51  ;;  %v695_v6 = vperm.slane %v1833_v47, 3 }
 0x193   :  { %v347_v8 = vpop.permute.xlu1 %346  ;;  %v458_v60 = vpop.permute.xlu0 %457 }
 0x194   :  { %v419_v0 = vperm.slane %v347_v8, %v1789_v11  ;;  %v716_v8 = vperm.slane %v1833_v47, 6 }
 0x196   :  { %v421_v32 = vsel %vm374_vm0, %v420_v24, %v419_v0  ;;  %vm1151_vm0 = vcmask 1045509  }
 0x197   :  { %v423_v43 = vsel %vm378_vm1, %v422_v36, %v421_v32 }
 0x199   :  { %609 = vperm.xlu2 %1554, %v604_v9   ;;  %1558 = vset.pattern.permute.xlu0 %v1679_v34 }
 0x19b   :  { %v356_v19 = vpop.permute.xlu1 %355  ;;  %v1893_v62 = vpop.permute.xlu0 %511 }
 0x19c   :  { %v424_v16 = vperm.slane %v356_v19, %v1808_v25  ;;  %v688_v25 = vperm.slane %v1833_v47, 2 }
 0x19e   :  { %v425_v48 = vsel %vm382_vm2, %v424_v16, %v423_v43 }
 0x19f   :  { %v440_v55 = vsel %vm435_vm4, %v425_v48, %v439_v15 }
 0x1a1   :  { %630 = vperm.xlu2 %1554, %v625_v22  }
 0x1a3   :  { %v365_v44 = vpop.permute.xlu1 %364  ;;  %v1896_v2 = vpop.permute.xlu0 %518 }
 0x1a4   :  { %v429_v49 = vperm.slane %v365_v44, %v1799_v18 }
 0x1a6   :  { %v430_v46 = vsel %vm378_vm1, %v429_v49, %v428_v50  ;;  %vm1153_vm1 = vcmask 1046534  }
 0x1a7   :  { %v432_v54 = vsel %vm382_vm2, %v431_v52, %v430_v46  ;;  %vm1155_vm2 = vcmask 1047559  }
 0x1a8   :  { %v441_v56 = vsel %vm437_vm5, %v432_v54, %v440_v55 }
 0x1a9   :  { %651 = vperm.xlu2 %1554, %v646_v53   ;;  %v448_v18 = vsel %vm444_vm6, %v441_v56, 0.0  ;;  %vm1214_vm6 = vcmask 31744  }
 0x1aa   :  { %449 = vadd.xlane.f32.xlu1 %v448_v18 }
 0x1ab   :  { %v1901_v42 = vpop.permute.xlu0 %525 }
 0x1b1   :  { %672 = vperm.xlu2 %1554, %v667_v57  }
 0x1b3   :  { %v1907_v9 = vpop.permute.xlu0 %546  ;;  %v1916_v21 = vpop.permute.xlu1 %539 }
 0x1b9   :  { %693 = vperm.xlu2 %1554, %v688_v25  }
 0x1bb   :  { %v1911_v10 = vpop.permute.xlu0 %553  ;;  %v1920_v24 = vpop.permute.xlu1 %574 }
 0x1c1   :  { %714 = vperm.xlu2 %1554, %v709_v58  }
 0x1c3   :  { %616 = vperm.xlu1 %1555, %v611_v59   ;;  %v1914_v19 = vpop.permute.xlu0 %560  ;;  %v1926_v39 = vpop.permute.xlu1 %595 }
 0x1c9   :  { %1556 = vset.pattern.permute.xlu2 %v1679_v34 }
 0x1cb   :  { %637 = vperm.xlu1 %1555, %v632_v61   ;;  %v1918_v47 = vpop.permute.xlu0 %581 }
 0x1d3   :  { %658 = vperm.xlu1 %1555, %v653_v63   ;;  %v1922_v16 = vpop.permute.xlu0 %602 }
 0x1db   :  { %679 = vperm.xlu1 %1555, %v674_v3   ;;  %v1934_v43 = vpop.permute.xlu0 %623 }
 0x1e3   :  { %700 = vperm.xlu1 %1555, %v695_v6   ;;  %v1944_v53 = vpop.permute.xlu0 %644 }
 0x1eb   :  { %721 = vperm.xlu1 %1555, %v716_v8   ;;  %v1956_v25 = vpop.permute.xlu0 %665 }
 0x1f3   :  { %1557 = vset.pattern.permute.xlu1 %v1679_v34 }
 0x1f4   :  { %v447_v13 = vpop.xlane.xlu2 %446 }
 0x1f5   :  { %v460_v14 = vadd.f32 %v458_v60, %v447_v13 }
 0x1f7   :  { %v1520_v17 = vmul.f32 -1.442695, %v460_v14 }
 0x1f9   :  { %1568 = vpow2.f32 %v1520_v17 }
 0x1fc   :  { %v1936_v44 = vpop.permute.xlu2 %609 }
 0x1ff   :  { %v1569_v0 = vpop.eup %1568 }
 0x200   :  { %v468_v20 = vadd.f32 1.0, %v1569_v0 }
 0x202   :  { %1570 = vrcp.f32 %v468_v20  ;;  %v481_v27 = vand.u32 2147483648, %v468_v20  ;;  %v479_v29 = vand.u32 2147483647, %v468_v20  ;;  %vm475_vm8 = vweird.f32 %v468_v20 }
 0x204   :  { %v482_v33 = vor.u32 1.1754944e-38, %v481_v27  ;;  %vm480_vm10 = vcmp.eq.f32.partialorder %v479_v29, 8.507059e+37  ;;  %v1946_v46 = vpop.permute.xlu2 %630 }
 0x208   :  { %v1571_v22 = vpop.eup %1570 }
 0x209   :  { %v471_v23 = vmul.f32 %v1571_v22, %v468_v20  ;;  %vm476_vm7 = vweird.f32 %v1571_v22 }
 0x20a   :  { %vm477_vm9 = vmor %vm475_vm8, %vm476_vm7 }
 0x20b   :  { %v472_v26 = vsub.f32 1.0, %v471_v23 }
 0x20c   :  { %v1960_v59 = vpop.permute.xlu2 %651 }
 0x20d   :  { %v473_v28 = vmul.f32 %v1571_v22, %v472_v26 }
 0x20f   :  { %v474_v32 = vadd.f32 %v1571_v22, %v473_v28 }
 0x211   :  { %v478_v35 = vsel %vm477_vm9, %v1571_v22, %v474_v32  ;;  %v1972_v22 = vpop.permute.xlu0 %686 }
 0x212   :  { %v483_v36 = vsel %vm480_vm10, %v482_v33, %v478_v35 }
 0x213   :  { %v1924_v37 = vmul.f32 %v483_v36, %v460_v14 }
 0x214   :  { %v1974_v23 = vpop.permute.xlu2 %672 }
 0x215   :  { %v762_v40 = vmul.f32 %v1893_v62, %v1924_v37  ;;  %v763_v38 = vmul.f32 %v1896_v2, %v1924_v37  ;;  %v764_v41 = vmul.f32 %v1901_v42, %v1924_v37  ;;  %v765_v45 = vmul.f32 %v1899_v4, %v1924_v37 }
 0x216   :  { %v766_v49 = vmul.f32 %v1916_v21, %v1924_v37  ;;  %v769_v51 = vmul.f32 %v1914_v19, %v1924_v37  ;;  %v767_v15 = vmul.f32 %v1907_v9, %v1924_v37  ;;  %v768_v54 = vmul.f32 %v1911_v10, %v1924_v37 }
 0x217   :  { %891 = vperm.xlu2 %1556, %v762_v40   ;;  %894 = vperm.xlu1 %1557, %v763_v38   ;;  %v772_v55 = vmul.f32 %v1918_v47, %v1924_v37  ;;  %v770_v57 = vmul.f32 %v1904_v7, %v1924_v37  ;;  %v771_v58 = vmul.f32 %v1920_v24, %v1924_v37 }
 0x218   :  { %897 = vperm.xlu0 %1558, %v764_v41   ;;  %v773_v6 = vmul.f32 %v1909_v5, %v1924_v37  ;;  %v774_v13 = vmul.f32 %v1926_v39, %v1924_v37  ;;  %v778_v0 = vmul.f32 %v1934_v43, %v1924_v37  ;;  %v776_v32 = vmul.f32 %v1936_v44, %v1924_v37 }
 0x219   :  { %v781_v36 = vmul.f32 %v1944_v53, %v1924_v37  ;;  %v708_v38 = vpop.permute.xlu0 %707 }
 0x21c   :  { %v694_v41 = vpop.permute.xlu2 %693 }
 0x21d   :  { %v450_v48 = vpop.xlane.xlu1 %449 }
 0x21e   :  { %v461_v50 = vadd.f32 %v458_v60, %v450_v48  ;;  %v775_v60 = vmul.f32 %v1922_v16, %v1924_v37 }
 0x21f   :  { %900 = vperm.xlu2 %1556, %v765_v45   ;;  %903 = vperm.xlu1 %1557, %v766_v49   ;;  %v779_v49 = vmul.f32 %v1946_v46, %v1924_v37 }
 0x220   :  { %v1521_v52 = vmul.f32 -1.442695, %v461_v50  ;;  %912 = vperm.xlu0 %1558, %v769_v51  }
 0x222   :  { %1572 = vpow2.f32 %v1521_v52  ;;  %v784_v52 = vmul.f32 %v1956_v25, %v1924_v37 }
 0x227   :  { %906 = vperm.xlu2 %1556, %v767_v15   ;;  %909 = vperm.xlu1 %1557, %v768_v54   ;;  %v782_v15 = vmul.f32 %v1960_v59, %v1924_v37 }
 0x228   :  { %v1573_v56 = vpop.eup %1572  ;;  %921 = vperm.xlu0 %1558, %v772_v55  }
 0x229   :  { %v469_v18 = vadd.f32 1.0, %v1573_v56 }
 0x22b   :  { %1574 = vrcp.f32 %v469_v18  ;;  %v496_v17 = vand.u32 2147483648, %v469_v18  ;;  %v494_v20 = vand.u32 2147483647, %v469_v18  ;;  %vm490_vm12 = vweird.f32 %v469_v18 }
 0x22d   :  { %v497_v28 = vor.u32 1.1754944e-38, %v496_v17  ;;  %vm495_vm14 = vcmp.eq.f32.partialorder %v494_v20, 8.507059e+37  ;;  %v2025_v20 = vpop.permute.xlu2 %714 }
 0x22f   :  { %915 = vperm.xlu2 %1556, %v770_v57   ;;  %918 = vperm.xlu1 %1557, %v771_v58   ;;  %v785_v57 = vmul.f32 %v1974_v23, %v1924_v37 }
 0x230   :  { %930 = vperm.xlu0 %1558, %v775_v60  }
 0x231   :  { %v1575_v61 = vpop.eup %1574 }
 0x232   :  { %v486_v63 = vmul.f32 %v1575_v61, %v469_v18  ;;  %vm491_vm11 = vweird.f32 %v1575_v61  ;;  %v787_v18 = vmul.f32 %v1972_v22, %v1924_v37 }
 0x233   :  { %vm492_vm13 = vmor %vm490_vm12, %vm491_vm11 }
 0x234   :  { %v487_v3 = vsub.f32 1.0, %v486_v63  ;;  %v790_v63 = vmul.f32 %v708_v38, %v1924_v37 }
 0x235   :  { %v1966_v8 = vpop.permute.xlu1 %616 }
 0x236   :  { %v488_v14 = vmul.f32 %v1575_v61, %v487_v3  ;;  %v777_v35 = vmul.f32 %v1966_v8, %v1924_v37  ;;  %v788_v3 = vmul.f32 %v694_v41, %v1924_v37 }
 0x237   :  { %924 = vperm.xlu2 %1556, %v773_v6   ;;  %927 = vperm.xlu1 %1557, %v774_v13   ;;  %v2017_v13 = vpop.permute.xlu0 %728 }
 0x238   :  { %v489_v26 = vadd.f32 %v1575_v61, %v488_v14  ;;  %939 = vperm.xlu0 %1558, %v778_v0   ;;  %v793_v0 = vmul.f32 %v2017_v13, %v1924_v37 }
 0x23a   :  { %v493_v27 = vsel %vm492_vm13, %v1575_v61, %v489_v26  ;;  %v791_v26 = vmul.f32 %v2025_v20, %v1924_v37 }
 0x23b   :  { %v498_v29 = vsel %vm495_vm14, %v497_v28, %v493_v27 }
 0x23c   :  { %v1984_v40 = vmul.f32 %v498_v29, %v461_v50 }
 0x23d   :  { %v1978_v33 = vpop.permute.xlu1 %637 }
 0x23e   :  { %v1987_v45 = vmul.f32 %v694_v41, %v1984_v40  ;;  %v1990_v48 = vmul.f32 %v708_v38, %v1984_v40  ;;  %v780_v50 = vmul.f32 %v1978_v33, %v1924_v37  ;;  %v796_v28 = vmul.f32 %v1901_v42, %v1984_v40 }
 0x23f   :  { %933 = vperm.xlu2 %1556, %v776_v32   ;;  %936 = vperm.xlu1 %1557, %v777_v35   ;;  %v794_v29 = vmul.f32 %v1893_v62, %v1984_v40  ;;  %v795_v32 = vmul.f32 %v1896_v2, %v1984_v40  ;;  %v799_v35 = vmul.f32 %v1907_v9, %v1984_v40 }
 0x240   :  { %948 = vperm.xlu0 %1558, %v781_v36   ;;  %v798_v42 = vmul.f32 %v1916_v21, %v1984_v40  ;;  %v802_v38 = vmul.f32 %v1904_v7, %v1984_v40  ;;  %v800_v2 = vmul.f32 %v1911_v10, %v1984_v40  ;;  %v801_v9 = vmul.f32 %v1914_v19, %v1984_v40 }
 0x241   :  { %v805_v41 = vmul.f32 %v1909_v5, %v1984_v40  ;;  %v803_v7 = vmul.f32 %v1920_v24, %v1984_v40  ;;  %v804_v21 = vmul.f32 %v1918_v47, %v1984_v40  ;;  %v806_v24 = vmul.f32 %v1926_v39, %v1984_v40 }
 0x245   :  { %v1994_v51 = vpop.permute.xlu1 %658 }
 0x246   :  { %v783_v55 = vmul.f32 %v1994_v51, %v1924_v37 }
 0x247   :  { %942 = vperm.xlu2 %1556, %v779_v49   ;;  %945 = vperm.xlu1 %1557, %v780_v50   ;;  %v808_v49 = vmul.f32 %v1936_v44, %v1984_v40 }
 0x248   :  { %957 = vperm.xlu0 %1558, %v784_v52  }
 0x24d   :  { %v680_v54 = vpop.permute.xlu1 %679 }
 0x24e   :  { %v2005_v56 = vmul.f32 %v680_v54, %v1984_v40  ;;  %v786_v60 = vmul.f32 %v680_v54, %v1924_v37  ;;  %v807_v54 = vmul.f32 %v1922_v16, %v1984_v40 }
 0x24f   :  { %951 = vperm.xlu2 %1556, %v782_v15   ;;  %954 = vperm.xlu1 %1557, %v783_v55  }
 0x250   :  { %966 = vperm.xlu0 %1558, %v787_v18   ;;  %v811_v18 = vmul.f32 %v1946_v46, %v1984_v40 }
 0x255   :  { %v701_v58 = vpop.permute.xlu1 %700 }
 0x256   :  { %v2013_v61 = vmul.f32 %v701_v58, %v1984_v40  ;;  %v789_v14 = vmul.f32 %v701_v58, %v1924_v37 }
 0x257   :  { %960 = vperm.xlu2 %1556, %v785_v57   ;;  %963 = vperm.xlu1 %1557, %v786_v60  }
 0x258   :  { %975 = vperm.xlu0 %1558, %v790_v63  }
 0x25d   :  { %v722_v6 = vpop.permute.xlu1 %721 }
 0x25e   :  { %v2021_v17 = vmul.f32 %v722_v6, %v1984_v40  ;;  %v792_v27 = vmul.f32 %v722_v6, %v1924_v37  ;;  %v797_v37 = vmul.f32 %v1899_v4, %v1984_v40  ;;  %v810_v6 = vmul.f32 %v1934_v43, %v1984_v40 }
 0x25f   :  { %969 = vperm.xlu2 %1556, %v788_v3   ;;  %972 = vperm.xlu1 %1557, %v789_v14   ;;  %v809_v3 = vmul.f32 %v1966_v8, %v1984_v40  ;;  %v812_v8 = vmul.f32 %v1978_v33, %v1984_v40  ;;  %v813_v43 = vmul.f32 %v1944_v53, %v1984_v40 }
 0x260   :  { %984 = vperm.xlu0 %1558, %v793_v0   ;;  %v814_v0 = vmul.f32 %v1960_v59, %v1984_v40  ;;  %v816_v33 = vmul.f32 %v1956_v25, %v1984_v40 }
 0x267   :  { %978 = vperm.xlu2 %1556, %v791_v26   ;;  %981 = vperm.xlu1 %1557, %v792_v27  }
 0x268   :  { %993 = vperm.xlu0 %1558, %v796_v28  }
 0x26f   :  { %987 = vperm.xlu2 %1556, %v794_v29   ;;  %990 = vperm.xlu1 %1557, %v795_v32   ;;  %v817_v29 = vmul.f32 %v1974_v23, %v1984_v40 }
 0x270   :  { %1002 = vperm.xlu0 %1558, %v799_v35  }
 0x271   :  { %v892_v36 = vpop.permute.xlu2 %891 }
 0x272   :  { %v1082_v5 = vperm.slane %v892_v36, %v1789_v11  ;;  %v815_v36 = vmul.f32 %v1994_v51, %v1984_v40 }
 0x277   :  { %996 = vperm.xlu2 %1556, %v797_v37   ;;  %999 = vperm.xlu1 %1557, %v798_v42   ;;  %v819_v42 = vmul.f32 %v1972_v22, %v1984_v40 }
 0x278   :  { %1011 = vperm.xlu0 %1558, %v802_v38   ;;  %v823_v38 = vmul.f32 %v2025_v20, %v1984_v40 }
 0x279   :  { %v901_v62 = vpop.permute.xlu2 %900 }
 0x27a   :  { %v1085_v47 = vperm.slane %v901_v62, %v1789_v11 }
 0x27f   :  { %1005 = vperm.xlu2 %1556, %v800_v2   ;;  %1008 = vperm.xlu1 %1557, %v801_v9  }
 0x280   :  { %1020 = vperm.xlu0 %1558, %v805_v41  }
 0x281   :  { %v907_v4 = vpop.permute.xlu2 %906 }
 0x282   :  { %v1087_v16 = vperm.slane %v907_v4, %v1789_v11 }
 0x287   :  { %1014 = vperm.xlu2 %1556, %v803_v7   ;;  %1017 = vperm.xlu1 %1557, %v804_v21  }
 0x288   :  { %1029 = vperm.xlu0 %1558, %v808_v49  }
 0x289   :  { %v2056_v10 = vpop.permute.xlu2 %915  ;;  %v895_v19 = vpop.permute.xlu1 %894 }
 0x28a   :  { %v1083_v50 = vperm.slane %v895_v19, %v1789_v11  ;;  %v898_v52 = vpop.permute.xlu0 %897  ;;  %v1090_v19 = vperm.slane %v2056_v10, %v1789_v11 }
 0x28b   :  { %v1084_v15 = vperm.slane %v898_v52, %v1789_v11 }
 0x28c   :  { %v1146_v44 = vsel %vm433_vm3, %v1083_v50, %v1082_v5 }
 0x28d   :  { %v1147_v55 = vsel %vm435_vm4, %v1084_v15, %v1146_v44 }
 0x28e   :  { %v1148_v57 = vsel %vm437_vm5, %v1085_v47, %v1147_v55 }
 0x28f   :  { %1023 = vperm.xlu2 %1556, %v806_v24   ;;  %1026 = vperm.xlu1 %1557, %v807_v54  }
 0x290   :  { %1038 = vperm.xlu0 %1558, %v811_v18  }
 0x291   :  { %v2071_v58 = vpop.permute.xlu2 %924  ;;  %v904_v39 = vpop.permute.xlu1 %903 }
 0x292   :  { %v1086_v60 = vperm.slane %v904_v39, %v1789_v11  ;;  %v2074_v63 = vpop.permute.xlu0 %912 }
 0x293   :  { %v1089_v52 = vperm.slane %v2074_v63, %v1789_v11 }
 0x294   :  { %v1150_v46 = vsel %vm1149_vm15, %v1086_v60, %v1148_v57 }
 0x295   :  { %v2083_v14 = vsel %vm1151_vm0, %v1087_v16, %v1150_v46  ;;  %v1093_v46 = vperm.slane %v2071_v58, %v1789_v11 }
 0x297   :  { %1032 = vperm.xlu2 %1556, %v809_v3   ;;  %1035 = vperm.xlu1 %1557, %v810_v6  }
 0x298   :  { %1047 = vperm.xlu0 %1558, %v814_v0  }
 0x299   :  { %v2087_v26 = vpop.permute.xlu2 %933  ;;  %v910_v27 = vpop.permute.xlu1 %909 }
 0x29a   :  { %v2089_v28 = vpop.permute.xlu0 %921  ;;  %v1088_v7 = vperm.slane %v910_v27, %v1789_v11 }
 0x29b   :  { %v1092_v55 = vperm.slane %v2089_v28, %v1789_v11 }
 0x29c   :  { %v1154_v50 = vsel %vm1153_vm1, %v1088_v7, %v2083_v14 }
 0x29d   :  { %v1156_v57 = vsel %vm1155_vm2, %v1089_v52, %v1154_v50 }
 0x29e   :  { %v1215_v27 = vsel %vm1214_vm6, %v1156_v57, 0.0 }
 0x29f   :  { %1041 = vperm.xlu2 %1556, %v812_v8   ;;  %1044 = vperm.xlu1 %1557, %v813_v43  }
 0x2a0   :  { %1056 = vperm.xlu0 %1558, %v817_v29  }
 0x2a1   :  { %v2097_v59 = vpop.permute.xlu2 %942  ;;  %v919_v32 = vpop.permute.xlu1 %918 }
 0x2a2   :  { %v2099_v35 = vpop.permute.xlu0 %930  ;;  %v1099_v44 = vperm.slane %v2097_v59, %v1789_v11 }
 0x2a7   :  { %1050 = vperm.xlu2 %1556, %v815_v36   ;;  %1053 = vperm.xlu1 %1557, %v816_v33  }
 0x2a8   :  { %1065 = vperm.xlu0 %1558, %v1987_v45  }
 0x2a9   :  { %v2106_v53 = vpop.permute.xlu2 %951  ;;  %v2108_v23 = vpop.permute.xlu1 %927 }
 0x2aa   :  { %v940_v37 = vpop.permute.xlu0 %939  ;;  %v1094_v63 = vperm.slane %v2108_v23, %v1789_v11  ;;  %v1102_v58 = vperm.slane %v2106_v53, %v1789_v11 }
 0x2ab   :  { %v1098_v5 = vperm.slane %v940_v37, %v1789_v11  ;;  %v1095_v37 = vperm.slane %v2099_v35, %v1789_v11 }
 0x2ad   :  { %v1164_v39 = vsel %vm433_vm3, %v1099_v44, %v1098_v5 }
 0x2af   :  { %1059 = vperm.xlu2 %1556, %v2005_v56   ;;  %1062 = vperm.xlu1 %1557, %v819_v42   ;;  %v825_v56 = vmul.f32 %v2017_v13, %v1984_v40  ;;  %v1091_v13 = vperm.slane %v919_v32, %v1789_v11 }
 0x2b0   :  { %1074 = vperm.xlu0 %1558, %v823_v38  }
 0x2b1   :  { %v2115_v25 = vpop.permute.xlu2 %960  ;;  %v2117_v51 = vpop.permute.xlu1 %936  ;;  %v1157_v10 = vsel %vm433_vm3, %v1091_v13, %v1090_v19 }
 0x2b2   :  { %v949_v45 = vpop.permute.xlu0 %948  ;;  %v1158_v60 = vsel %vm435_vm4, %v1092_v55, %v1157_v10 }
 0x2b3   :  { %v1101_v6 = vperm.slane %v949_v45, %v1789_v11  ;;  %v1159_v43 = vsel %vm437_vm5, %v1093_v46, %v1158_v60 }
 0x2b4   :  { %v1160_v36 = vsel %vm1149_vm15, %v1094_v63, %v1159_v43 }
 0x2b5   :  { %v1161_v53 = vsel %vm1151_vm0, %v1095_v37, %v1160_v36 }
 0x2b7   :  { %1068 = vperm.xlu2 %1556, %v2013_v61   ;;  %1071 = vperm.xlu1 %1557, %v1990_v48  }
 0x2b8   :  { %1560 = vset.pattern.permute.xlu0 %v1734_v31 }
 0x2b9   :  { %v970_v62 = vpop.permute.xlu2 %969  ;;  %v946_v22 = vpop.permute.xlu1 %945 }
 0x2ba   :  { %v2122_v2 = vpop.permute.xlu0 %957  ;;  %v1100_v15 = vperm.slane %v946_v22, %v1789_v11 }
 0x2bc   :  { %v1165_v16 = vsel %vm435_vm4, %v1100_v15, %v1164_v39 }
 0x2bd   :  { %v1166_v29 = vsel %vm437_vm5, %v1101_v6, %v1165_v16 }
 0x2be   :  { %v1167_v42 = vsel %vm1149_vm15, %v1102_v58, %v1166_v29 }
 0x2bf   :  { %1077 = vperm.xlu2 %1556, %v2021_v17   ;;  %1080 = vperm.xlu1 %1557, %v825_v56   ;;  %v1096_v56 = vperm.slane %v2087_v26, %v1789_v11 }
 0x2c1   :  { %v979_v20 = vpop.permute.xlu2 %978  ;;  %v955_v9 = vpop.permute.xlu1 %954 }
 0x2c2   :  { %v967_v41 = vpop.permute.xlu0 %966  ;;  %v1111_v14 = vperm.slane %v979_v20, %v1789_v11  ;;  %v1103_v59 = vperm.slane %v955_v9, %v1789_v11  ;;  %v1104_v20 = vperm.slane %v2122_v2, %v1789_v11 }
 0x2c3   :  { %v1107_v40 = vperm.slane %v967_v41, %v1789_v11 }
 0x2c4   :  { %v1168_v22 = vsel %vm1151_vm0, %v1103_v59, %v1167_v42 }
 0x2c7   :  { %1561 = vset.pattern.permute.xlu2 %v1723_v12  ;;  %1559 = vset.pattern.permute.xlu1 %v1718_v1  ;;  %v1108_v12 = vperm.slane %v970_v62, %v1789_v11  ;;  %v1097_v62 = vperm.slane %v2117_v51, %v1789_v11  ;;  %v1169_v51 = vsel %vm1153_vm1, %v1104_v20, %v1168_v22 }
 0x2c9   :  { %v964_v48 = vpop.permute.xlu1 %963  ;;  %v2129_v61 = vpop.permute.xlu2 %987 }
 0x2ca   :  { %v976_v31 = vpop.permute.xlu0 %975  ;;  %v1106_v4 = vperm.slane %v964_v48, %v1789_v11  ;;  %v1114_v26 = vperm.slane %v2129_v61, %v1789_v11 }
 0x2cb   :  { %v1110_v18 = vperm.slane %v976_v31, %v1789_v11  ;;  %v1162_v31 = vsel %vm1153_vm1, %v1096_v56, %v1161_v53 }
 0x2cc   :  { %v1171_v17 = vsel %vm433_vm3, %v1107_v40, %v1106_v4  ;;  %v1105_v4 = vperm.slane %v2115_v25, %v1789_v11  ;;  %v1163_v7 = vsel %vm1155_vm2, %v1097_v62, %v1162_v31 }
 0x2cd   :  { %v1172_v47 = vsel %vm435_vm4, %v1108_v12, %v1171_v17  ;;  %v1218_v13 = vsel %vm1214_vm6, %v1163_v7, 0.0 }
 0x2ce   :  { %v1170_v2 = vsel %vm1155_vm2, %v1105_v4, %v1169_v51 }
 0x2cf   :  { %v1221_v12 = vsel %vm1214_vm6, %v1170_v2, 0.0 }
 0x2d1   :  { %v973_v21 = vpop.permute.xlu1 %972  ;;  %v2146_v24 = vpop.permute.xlu2 %996 }
 0x2d2   :  { %v1109_v1 = vperm.slane %v973_v21, %v1789_v11  ;;  %v985_v49 = vpop.permute.xlu0 %984 }
 0x2d3   :  { %v1113_v33 = vperm.slane %v985_v49, %v1789_v11  ;;  %v1117_v49 = vperm.slane %v2146_v24, %v1789_v11 }
 0x2d4   :  { %v1173_v54 = vsel %vm437_vm5, %v1109_v1, %v1172_v47 }
 0x2d5   :  { %v1174_v3 = vsel %vm1149_vm15, %v1110_v18, %v1173_v54 }
 0x2d6   :  { %v1175_v32 = vsel %vm1151_vm0, %v1111_v14, %v1174_v3 }
 0x2d9   :  { %v982_v0 = vpop.permute.xlu1 %981  ;;  %v1006_v38 = vpop.permute.xlu2 %1005 }
 0x2da   :  { %v1112_v28 = vperm.slane %v982_v0, %v1789_v11  ;;  %1216 = vadd.xlane.f32.xlu0 %v1215_v27  ;;  %v994_v8 = vpop.permute.xlu0 %993  ;;  %v1120_v47 = vperm.slane %v1006_v38, %v1789_v11 }
 0x2db   :  { %v1116_v17 = vperm.slane %v994_v8, %v1789_v11 }
 0x2dc   :  { %v1176_v23 = vsel %vm1153_vm1, %v1112_v28, %v1175_v32 }
 0x2dd   :  { %v1177_v45 = vsel %vm1155_vm2, %v1113_v33, %v1176_v23 }
 0x2de   :  { %v1224_v35 = vsel %vm1214_vm6, %v1177_v45, 0.0 }
 0x2e1   :  { %v991_v9 = vpop.permute.xlu1 %990  ;;  %v1015_v21 = vpop.permute.xlu2 %1014 }
 0x2e2   :  { %v1115_v41 = vperm.slane %v991_v9, %v1789_v11  ;;  %1225 = vadd.xlane.f32.xlu0 %v1224_v35  ;;  %v1003_v48 = vpop.permute.xlu0 %1002  ;;  %v1123_v63 = vperm.slane %v1015_v21, %v1789_v11 }
 0x2e3   :  { %v1119_v52 = vperm.slane %v1003_v48, %v1789_v11 }
 0x2e4   :  { %v1178_v40 = vsel %vm433_vm3, %v1115_v41, %v1114_v26 }
 0x2e5   :  { %v1179_v1 = vsel %vm435_vm4, %v1116_v17, %v1178_v40 }
 0x2e6   :  { %v1180_v5 = vsel %vm437_vm5, %v1117_v49, %v1179_v1  ;;  %v1567_v1 = vld [vmem:[%s2313_s4] ss:$0 sm:$0xff]  ;;  %s1680_s4 = smov [#allocation5]  }
 0x2e7   :  { %s1505_s10 = sshll.u32 %s1680_s4, 4  ;;  %s1506_s10 = int_to_ptr.vmem [resolvable:$true] %s1505_s10 }
 0x2e8   :  { %1219 = vadd.xlane.f32.xlu2 %v1218_v13 }
 0x2e9   :  { %v1000_v25 = vpop.permute.xlu1 %999  ;;  %1222 = vadd.xlane.f32.xlu1 %v1221_v12  ;;  %v1024_v10 = vpop.permute.xlu2 %1023 }
 0x2ea   :  { %v1118_v61 = vperm.slane %v1000_v25, %v1789_v11  ;;  %v1012_v19 = vpop.permute.xlu0 %1011  ;;  %v1126_v28 = vperm.slane %v1024_v10, %v1789_v11 }
 0x2eb   :  { %v1122_v39 = vperm.slane %v1012_v19, %v1789_v11 }
 0x2ec   :  { %v1181_v50 = vsel %vm1149_vm15, %v1118_v61, %v1180_v5 }
 0x2ed   :  { %v1182_v15 = vsel %vm1151_vm0, %v1119_v52, %v1181_v50  ;;  %v1185_v46 = vsel %vm433_vm3, %v1123_v63, %v1122_v39 }
 0x2ee   :  { %v1183_v24 = vsel %vm1153_vm1, %v1120_v47, %v1182_v15 }
 0x2f1   :  { %v1009_v44 = vpop.permute.xlu1 %1008  ;;  %v1033_v6 = vpop.permute.xlu2 %1032 }
 0x2f2   :  { %v1121_v54 = vperm.slane %v1009_v44, %v1789_v11  ;;  %v1021_v55 = vpop.permute.xlu0 %1020  ;;  %v1129_v58 = vperm.slane %v1033_v6, %v1789_v11 }
 0x2f3   :  { %v1125_v0 = vperm.slane %v1021_v55, %v1789_v11 }
 0x2f4   :  { %v1184_v18 = vsel %vm1155_vm2, %v1121_v54, %v1183_v24 }
 0x2f5   :  { %v1227_v57 = vsel %vm1214_vm6, %v1184_v18, 0.0 }
 0x2f6   :  { %1228 = vadd.xlane.f32.xlu2 %v1227_v57 }
 0x2f9   :  { %v1018_v60 = vpop.permute.xlu1 %1017  ;;  %v1042_v23 = vpop.permute.xlu2 %1041 }
 0x2fa   :  { %v1124_v16 = vperm.slane %v1018_v60, %v1789_v11  ;;  %v1030_v3 = vpop.permute.xlu0 %1029  ;;  %v1132_v9 = vperm.slane %v1042_v23, %v1789_v11 }
 0x2fb   :  { %v1128_v29 = vperm.slane %v1030_v3, %v1789_v11 }
 0x2fc   :  { %v1186_v14 = vsel %vm435_vm4, %v1124_v16, %v1185_v46 }
 0x2fd   :  { %v1187_v27 = vsel %vm437_vm5, %v1125_v0, %v1186_v14 }
 0x2fe   :  { %v1188_v59 = vsel %vm1149_vm15, %v1126_v28, %v1187_v27 }
 0x301   :  { %v1027_v8 = vpop.permute.xlu1 %1026  ;;  %v1051_v53 = vpop.permute.xlu2 %1050 }
 0x302   :  { %v1127_v43 = vperm.slane %v1027_v8, %v1789_v11  ;;  %v1039_v32 = vpop.permute.xlu0 %1038  ;;  %v1135_v7 = vperm.slane %v1051_v53, %v1789_v11 }
 0x303   :  { %v1131_v22 = vperm.slane %v1039_v32, %v1789_v11 }
 0x304   :  { %v1189_v36 = vsel %vm1151_vm0, %v1127_v43, %v1188_v59 }
 0x305   :  { %v1190_v33 = vsel %vm1153_vm1, %v1128_v29, %v1189_v36 }
 0x306   :  { %v1191_v37 = vsel %vm1155_vm2, %v1129_v58, %v1190_v33 }
 0x307   :  { %v1230_v42 = vsel %vm1214_vm6, %v1191_v37, 0.0 }
 0x308   :  { %1231 = vadd.xlane.f32.xlu1 %v1230_v42 }
 0x309   :  { %v1036_v38 = vpop.permute.xlu1 %1035  ;;  %v1060_v2 = vpop.permute.xlu2 %1059 }
 0x30a   :  { %v1130_v45 = vperm.slane %v1036_v38, %v1789_v11  ;;  %v1048_v62 = vpop.permute.xlu0 %1047  ;;  %v1138_v5 = vperm.slane %v1060_v2, %v1789_v11 }
 0x30b   :  { %v1134_v31 = vperm.slane %v1048_v62, %v1789_v11 }
 0x30c   :  { %v1192_v56 = vsel %vm433_vm3, %v1131_v22, %v1130_v45 }
 0x30d   :  { %v1193_v41 = vsel %vm435_vm4, %v1132_v9, %v1192_v56 }
 0x311   :  { %v1045_v20 = vpop.permute.xlu1 %1044  ;;  %v1069_v50 = vpop.permute.xlu2 %1068 }
 0x312   :  { %v1133_v35 = vperm.slane %v1045_v20, %v1789_v11  ;;  %v1057_v51 = vpop.permute.xlu0 %1056  ;;  %v1141_v10 = vperm.slane %v1069_v50, %v1789_v11 }
 0x313   :  { %v1137_v13 = vperm.slane %v1057_v51, %v1789_v11 }
 0x314   :  { %v1194_v48 = vsel %vm437_vm5, %v1133_v35, %v1193_v41 }
 0x315   :  { %v1195_v4 = vsel %vm1149_vm15, %v1134_v31, %v1194_v48 }
 0x316   :  { %v1196_v17 = vsel %vm1151_vm0, %v1135_v7, %v1195_v4 }
 0x319   :  { %v1054_v26 = vpop.permute.xlu1 %1053  ;;  %v1078_v57 = vpop.permute.xlu2 %1077 }
 0x31a   :  { %v1136_v40 = vperm.slane %v1054_v26, %v1789_v11  ;;  %v1066_v49 = vpop.permute.xlu0 %1065  ;;  %v1144_v63 = vperm.slane %v1078_v57, %v1789_v11 }
 0x31b   :  { %v1140_v15 = vperm.slane %v1066_v49, %v1789_v11 }
 0x31c   :  { %v1197_v21 = vsel %vm1153_vm1, %v1136_v40, %v1196_v17 }
 0x31d   :  { %v1198_v12 = vsel %vm1155_vm2, %v1137_v13, %v1197_v21 }
 0x31e   :  { %v1233_v25 = vsel %vm1214_vm6, %v1198_v12, 0.0 }
 0x31f   :  { %1234 = vadd.xlane.f32.xlu0 %v1233_v25 }
 0x321   :  { %v1063_v61 = vpop.permute.xlu1 %1062  ;;  %1245 = vperm.xlu1 %1559, %v1567_v1  }
 0x322   :  { %v1139_v19 = vperm.slane %v1063_v61, %v1789_v11  ;;  %v1075_v55 = vpop.permute.xlu0 %1074 }
 0x323   :  { %v1143_v39 = vperm.slane %v1075_v55, %v1789_v11 }
 0x324   :  { %v1199_v52 = vsel %vm433_vm3, %v1139_v19, %v1138_v5 }
 0x325   :  { %v1200_v47 = vsel %vm435_vm4, %v1140_v15, %v1199_v52 }
 0x326   :  { %v1201_v24 = vsel %vm437_vm5, %v1141_v10, %v1200_v47 }
 0x329   :  { %v1072_v44 = vpop.permute.xlu1 %1071  ;;  %1562 = vset.pattern.permute.xlu1 %v1730_v30 }
 0x32a   :  { %v1142_v54 = vperm.slane %v1072_v44, %v1789_v11 }
 0x32c   :  { %v1202_v18 = vsel %vm1149_vm15, %v1142_v54, %v1201_v24 }
 0x32d   :  { %v1203_v60 = vsel %vm1151_vm0, %v1143_v39, %v1202_v18 }
 0x32e   :  { %v1204_v3 = vsel %vm1153_vm1, %v1144_v63, %v1203_v60 }
 0x331   :  { %v1081_v16 = vpop.permute.xlu1 %1080  ;;  %1263 = vperm.xlu1 %1562, %v1567_v1  }
 0x332   :  { %v1145_v30 = vperm.slane %v1081_v16, %v1789_v11 }
 0x333   :  { %1251 = vperm.xlu0 %1560, %v1567_v1  }
 0x334   :  { %v1205_v46 = vsel %vm1155_vm2, %v1145_v30, %v1204_v3 }
 0x335   :  { %v1236_v6 = vsel %vm1214_vm6, %v1205_v46, 0.0 }
 0x336   :  { %1237 = vadd.xlane.f32.xlu2 %v1236_v6 }
 0x339   :  { %1564 = vset.pattern.permute.xlu1 %v1679_v34 }
 0x33b   :  { %1565 = vset.pattern.permute.xlu0 %v1679_v34 }
 0x34d   :  { %v1217_v0 = vpop.xlane.xlu0 %1216 }
 0x34e   :  { %1257 = vperm.xlu2 %1561, %v1567_v1  }
 0x355   :  { %v1226_v59 = vpop.xlane.xlu0 %1225 }
 0x356   :  { %1563 = vset.pattern.permute.xlu2 %v1679_v34 }
 0x35b   :  { %v1220_v27 = vpop.xlane.xlu2 %1219 }
 0x35c   :  { %v2272_v14 = vpop.xlane.xlu1 %1222 }
 0x369   :  { %v1229_v28 = vpop.xlane.xlu2 %1228 }
 0x37b   :  { %v1232_v11 = vpop.xlane.xlu1 %1231 }
 0x392   :  { %v1235_v36 = vpop.xlane.xlu0 %1234 }
 0x393   :  { %v1246_v8 = vpop.permute.xlu1 %1245 }
 0x394   :  { %v1269_v43 = vadd.f32 %v1246_v8, %v1217_v0  ;;  %v1273_v29 = vadd.f32 %v1246_v8, %v1229_v28 }
 0x396   :  { %v1522_v32 = vmul.f32 -1.442695, %v1269_v43  ;;  %v1526_v58 = vmul.f32 -1.442695, %v1273_v29 }
 0x398   :  { %1576 = vpow2.f32 %v1522_v32 }
 0x399   :  { %1578 = vpow2.f32 %v1526_v58 }
 0x39e   :  { %v1577_v33 = vpop.eup %1576 }
 0x39f   :  { %v1579_v23 = vpop.eup %1578  ;;  %v1301_v37 = vadd.f32 1.0, %v1577_v33 }
 0x3a0   :  { %v1305_v42 = vadd.f32 1.0, %v1579_v23 }
 0x3a1   :  { %1580 = vrcp.f32 %v1301_v37  ;;  %v1318_v26 = vand.u32 2147483647, %v1301_v37  ;;  %v1320_v2 = vand.u32 2147483648, %v1301_v37  ;;  %vm1314_vm7 = vweird.f32 %v1301_v37 }
 0x3a2   :  { %1582 = vrcp.f32 %v1305_v42  ;;  %v1378_v7 = vand.u32 2147483647, %v1305_v42  ;;  %v1380_v13 = vand.u32 2147483648, %v1305_v42  ;;  %vm1374_vm5 = vweird.f32 %v1305_v42 }
 0x3a3   :  { %v1264_v34 = vpop.permute.xlu1 %1263  ;;  %vm1319_vm9 = vcmp.eq.f32.partialorder %v1318_v26, 8.507059e+37  ;;  %v1321_v61 = vor.u32 1.1754944e-38, %v1320_v2 }
 0x3a4   :  { %v1272_v38 = vadd.f32 %v1264_v34, %v1226_v59  ;;  %vm1379_vm11 = vcmp.eq.f32.partialorder %v1378_v7, 8.507059e+37  ;;  %v1381_v50 = vor.u32 1.1754944e-38, %v1380_v13 }
 0x3a5   :  { %v1252_v45 = vpop.permute.xlu0 %1251 }
 0x3a6   :  { %v1525_v62 = vmul.f32 -1.442695, %v1272_v38  ;;  %v1270_v22 = vadd.f32 %v1252_v45, %v1220_v27  ;;  %v1274_v53 = vadd.f32 %v1252_v45, %v1232_v11 }
 0x3a7   :  { %v1581_v56 = vpop.eup %1580 }
 0x3a8   :  { %v1583_v20 = vpop.eup %1582  ;;  %1584 = vpow2.f32 %v1525_v62  ;;  %v1523_v9 = vmul.f32 -1.442695, %v1270_v22  ;;  %v1310_v35 = vmul.f32 %v1581_v56, %v1301_v37  ;;  %v1527_v31 = vmul.f32 -1.442695, %v1274_v53 }
 0x3a9   :  { %v1238_v41 = vpop.xlane.xlu2 %1237  ;;  %v1370_v48 = vmul.f32 %v1583_v20, %v1305_v42  ;;  %vm1315_vm3 = vweird.f32 %v1581_v56  ;;  %vm1375_vm4 = vweird.f32 %v1583_v20 }
 0x3aa   :  { %1586 = vpow2.f32 %v1523_v9  ;;  %v1311_v51 = vsub.f32 1.0, %v1310_v35  ;;  %v1276_v40 = vadd.f32 %v1264_v34, %v1238_v41  ;;  %vm1316_vm8 = vmor %vm1314_vm7, %vm1315_vm3 }
 0x3ab   :  { %v1371_v4 = vsub.f32 1.0, %v1370_v48  ;;  %1588 = vpow2.f32 %v1527_v31  ;;  %vm1376_vm10 = vmor %vm1374_vm5, %vm1375_vm4 }
 0x3ac   :  { %v1312_v17 = vmul.f32 %v1581_v56, %v1311_v51  ;;  %v1529_v5 = vmul.f32 -1.442695, %v1276_v40 }
 0x3ad   :  { %v1372_v21 = vmul.f32 %v1583_v20, %v1371_v4 }
 0x3ae   :  { %v1585_v12 = vpop.eup %1584  ;;  %v1313_v1 = vadd.f32 %v1581_v56, %v1312_v17 }
 0x3af   :  { %v2274_v25 = vadd.f32 1.0, %v1585_v12  ;;  %v1373_v49 = vadd.f32 %v1583_v20, %v1372_v21 }
 0x3b0   :  { %v1587_v19 = vpop.eup %1586  ;;  %v1317_v52 = vsel %vm1316_vm8, %v1581_v56, %v1313_v1 }
 0x3b1   :  { %1590 = vrcp.f32 %v2274_v25  ;;  %v1302_v15 = vadd.f32 1.0, %v1587_v19  ;;  %v1258_v47 = vpop.permute.xlu2 %1257  ;;  %v1377_v44 = vsel %vm1376_vm10, %v1583_v20, %v1373_v49  ;;  %v1322_v10 = vsel %vm1319_vm9, %v1321_v61, %v1317_v52  ;;  %v1589_v18 = vpop.eup %1588 }
 0x3b2   :  { %v1271_v54 = vadd.f32 %v1258_v47, %v2272_v14  ;;  %v1275_v55 = vadd.f32 %v1258_v47, %v1235_v36  ;;  %v1382_v24 = vsel %vm1379_vm11, %v1381_v50, %v1377_v44  ;;  %1431 = vperm.xlu2 %1563, %v1322_v10   ;;  %v2278_v63 = vadd.f32 1.0, %v1589_v18 }
 0x3b3   :  { %1592 = vrcp.f32 %v1302_v15  ;;  %1451 = vperm.xlu0 %1565, %v1382_v24   ;;  %v1335_v11 = vand.u32 2147483648, %v1302_v15  ;;  %v1333_v29 = vand.u32 2147483647, %v1302_v15  ;;  %vm1329_vm13 = vweird.f32 %v1302_v15 }
 0x3b4   :  { %v1524_v57 = vmul.f32 -1.442695, %v1271_v54  ;;  %v1528_v39 = vmul.f32 -1.442695, %v1275_v55  ;;  %1594 = vpow2.f32 %v1529_v5  ;;  %v1365_v45 = vand.u32 2147483648, %v2274_v25 }
 0x3b5   :  { %v1336_v33 = vor.u32 1.1754944e-38, %v1335_v11  ;;  %vm1334_vm15 = vcmp.eq.f32.partialorder %v1333_v29, 8.507059e+37  ;;  %vm1359_vm1 = vweird.f32 %v2274_v25  ;;  %v1363_v62 = vand.u32 2147483647, %v2274_v25  ;;  %v1612_v29 = vld [vmem:[#allocation2 + $0x20] sm:$0xff] }
 0x3b6   :  { %1596 = vpow2.f32 %v1524_v57  ;;  %v1366_v48 = vor.u32 1.1754944e-38, %v1365_v45  ;;  %v1393_v47 = vand.u32 2147483647, %v2278_v63 }
 0x3b7   :  { %v1591_v60 = vpop.eup %1590  ;;  %1598 = vpow2.f32 %v1528_v39  ;;  %vm1364_vm6 = vcmp.eq.f32.partialorder %v1363_v62, 8.507059e+37  ;;  %v1617_v62 = vld [vmem:[#allocation2 + $0x18] sm:$0xff] }
 0x3b8   :  { %v1355_v16 = vmul.f32 %v1591_v60, %v2274_v25  ;;  %1600 = vrcp.f32 %v2278_v63  ;;  %vm1360_vm0 = vweird.f32 %v1591_v60 }
 0x3b9   :  { %v1593_v30 = vpop.eup %1592  ;;  %vm1361_vm2 = vmor %vm1359_vm1, %vm1360_vm0 }
 0x3ba   :  { %v1325_v3 = vmul.f32 %v1593_v30, %v1302_v15  ;;  %v1595_v46 = vpop.eup %1594  ;;  %v1356_v0 = vsub.f32 1.0, %v1355_v16  ;;  %vm1330_vm12 = vweird.f32 %v1593_v30  ;;  %v1395_v15 = vand.u32 2147483648, %v2278_v63 }
 0x3bb   :  { %v2282_v8 = vadd.f32 1.0, %v1595_v46  ;;  %vm1331_vm14 = vmor %vm1329_vm13, %vm1330_vm12  ;;  %vm1389_vm13 = vweird.f32 %v2278_v63 }
 0x3bc   :  { %v1597_v6 = vpop.eup %1596  ;;  %v1326_v14 = vsub.f32 1.0, %v1325_v3  ;;  %v1357_v58 = vmul.f32 %v1591_v60, %v1356_v0  ;;  %v1396_v55 = vor.u32 1.1754944e-38, %v1395_v15  ;;  %v1608_v3 = vld [vmem:[#allocation2] sm:$0xff] }
 0x3bd   :  { %v1303_v27 = vadd.f32 1.0, %v1597_v6  ;;  %v1599_v28 = vpop.eup %1598  ;;  %v1425_v57 = vand.u32 2147483648, %v2282_v8  ;;  %vm1419_vm1 = vweird.f32 %v2282_v8  ;;  %v1423_v39 = vand.u32 2147483647, %v2282_v8  ;;  %v1609_v6 = vld [vmem:[#allocation2 + $0x8] sm:$0xff] }
 0x3be   :  { %v1327_v43 = vmul.f32 %v1593_v30, %v1326_v14  ;;  %v1307_v59 = vadd.f32 1.0, %v1599_v28  ;;  %v2284_v36 = vpop.eup %1600  ;;  %v1358_v42 = vadd.f32 %v1591_v60, %v1357_v58  ;;  %v1611_v28 = vld [vmem:[#allocation2 + $0x48] sm:$0xff] }
 0x3bf   :  { %1602 = vrcp.f32 %v1303_v27  ;;  %v1385_v34 = vmul.f32 %v2284_v36, %v2278_v63  ;;  %v1348_v31 = vand.u32 2147483647, %v1303_v27  ;;  %v1350_v51 = vand.u32 2147483648, %v1303_v27 }
 0x3c0   :  { %v1328_v32 = vadd.f32 %v1593_v30, %v1327_v43  ;;  %1604 = vrcp.f32 %v1307_v59  ;;  %v1362_v20 = vsel %vm1361_vm2, %v1591_v60, %v1358_v42  ;;  %vm1344_vm4 = vweird.f32 %v1303_v27 }
 0x3c1   :  { %1606 = vrcp.f32 %v2282_v8  ;;  %v1386_v41 = vsub.f32 1.0, %v1385_v34  ;;  %v1367_v26 = vsel %vm1364_vm6, %v1366_v48, %v1362_v20  ;;  %vm1349_vm8 = vcmp.eq.f32.partialorder %v1348_v31, 8.507059e+37  ;;  %v1620_v48 = vld [vmem:[#allocation2 + $0x30] sm:$0xff] }
 0x3c2   :  { %v1332_v23 = vsel %vm1331_vm14, %v1593_v30, %v1328_v32  ;;  %v1351_v21 = vor.u32 1.1754944e-38, %v1350_v51  ;;  %v1410_v12 = vand.u32 2147483648, %v1307_v59  ;;  %vm1404_vm9 = vweird.f32 %v1307_v59  ;;  %v1613_v32 = vld [vmem:[#allocation2 + $0x28] sm:$0xff]  ;;  %v1621_v51 = vld [vmem:[#allocation2 + $0x38] sm:$0xff] }
 0x3c3   :  { %v1337_v37 = vsel %vm1334_vm15, %v1336_v33, %v1332_v23  ;;  %v1387_v17 = vmul.f32 %v2284_v36, %v1386_v41  ;;  %v1408_v49 = vand.u32 2147483647, %v1307_v59  ;;  %vm1390_vm11 = vweird.f32 %v2284_v36  ;;  %v1614_v33 = vld [vmem:[#allocation2 + $0x50] sm:$0xff] }
 0x3c4   :  { %1436 = vperm.xlu1 %1564, %v1337_v37   ;;  %v1411_v52 = vor.u32 1.1754944e-38, %v1410_v12  ;;  %vm1391_vm14 = vmor %vm1389_vm13, %vm1390_vm11  ;;  %vm1394_vm15 = vcmp.eq.f32.partialorder %v1393_v47, 8.507059e+37  ;;  %v1426_v63 = vor.u32 1.1754944e-38, %v1425_v57  ;;  %vm1424_vm6 = vcmp.eq.f32.partialorder %v1423_v39, 8.507059e+37  ;;  %v1615_v37 = vld [vmem:[#allocation2 + $0x58] sm:$0xff] }
 0x3c5   :  { %v1603_v38 = vpop.eup %1602  ;;  %v1388_v5 = vadd.f32 %v2284_v36, %v1387_v17  ;;  %vm1409_vm12 = vcmp.eq.f32.partialorder %v1408_v49, 8.507059e+37 }
 0x3c6   :  { %v1340_v22 = vmul.f32 %v1603_v38, %v1303_v27  ;;  %v1605_v53 = vpop.eup %1604  ;;  %vm1345_vm3 = vweird.f32 %v1603_v38  ;;  %v1610_v27 = vld [vmem:[#allocation2 + $0x40] sm:$0xff] }
 0x3c7   :  { %v1607_v56 = vpop.eup %1606  ;;  %v1400_v35 = vmul.f32 %v1605_v53, %v1307_v59  ;;  %vm1405_vm5 = vweird.f32 %v1605_v53  ;;  %vm1346_vm7 = vmor %vm1344_vm4, %vm1345_vm3  ;;  %v1392_v10 = vsel %vm1391_vm14, %v2284_v36, %v1388_v5 }
 0x3c8   :  { %v1341_v9 = vsub.f32 1.0, %v1340_v22  ;;  %v1415_v2 = vmul.f32 %v1607_v56, %v2282_v8  ;;  %vm1406_vm10 = vmor %vm1404_vm9, %vm1405_vm5  ;;  %v1397_v24 = vsel %vm1394_vm15, %v1396_v55, %v1392_v10  ;;  %vm1420_vm0 = vweird.f32 %v1607_v56 }
 0x3c9   :  { %v1401_v7 = vsub.f32 1.0, %v1400_v35  ;;  %vm1421_vm2 = vmor %vm1419_vm1, %vm1420_vm0 }
 0x3ca   :  { %v1342_v4 = vmul.f32 %v1603_v38, %v1341_v9  ;;  %v1416_v50 = vsub.f32 1.0, %v1415_v2  ;;  %v1619_v9 = vld [vmem:[#allocation2 + $0x78] sm:$0xff] }
 0x3cb   :  { %v1402_v13 = vmul.f32 %v1605_v53, %v1401_v7 }
 0x3cc   :  { %1446 = vperm.xlu1 %1564, %v1367_v26   ;;  %v1343_v40 = vadd.f32 %v1603_v38, %v1342_v4  ;;  %v1417_v54 = vmul.f32 %v1607_v56, %v1416_v50  ;;  %v1622_v26 = vld [vmem:[#allocation2 + $0x60] sm:$0xff] }
 0x3cd   :  { %v1403_v25 = vadd.f32 %v1605_v53, %v1402_v13 }
 0x3ce   :  { %v1347_v1 = vsel %vm1346_vm7, %v1603_v38, %v1343_v40  ;;  %v1418_v18 = vadd.f32 %v1607_v56, %v1417_v54  ;;  %v1616_v38 = vld [vmem:[#allocation2 + $0x10] sm:$0xff]  ;;  %v1623_v40 = vld [vmem:[#allocation2 + $0x68] sm:$0xff] }
 0x3cf   :  { %v1352_v61 = vsel %vm1349_vm8, %v1351_v21, %v1347_v1  ;;  %v1407_v19 = vsel %vm1406_vm10, %v1605_v53, %v1403_v25 }
 0x3d0   :  { %1441 = vperm.xlu2 %1563, %v1352_v61   ;;  %v1412_v44 = vsel %vm1409_vm12, %v1411_v52, %v1407_v19  ;;  %v1422_v60 = vsel %vm1421_vm2, %v1607_v56, %v1418_v18  ;;  %v1618_v56 = vld [vmem:[#allocation2 + $0x70] sm:$0xff] }
 0x3d1   :  { %v1427_v16 = vsel %vm1424_vm6, %v1426_v63, %v1422_v60 }
 0x3d4   :  { %1461 = vperm.xlu1 %1564, %v1412_v44  }
 0x3d8   :  { %1456 = vperm.xlu2 %1563, %v1397_v24  }
 0x3e0   :  { %1466 = vperm.xlu2 %1563, %v1427_v16  }
 0x40c   :  { %v1432_v30 = vpop.permute.xlu2 %1431 }
 0x40d   :  { %v1469_v46 = vmul.f32 %v1608_v3, %v1432_v30  ;;  %v1470_v14 = vmul.f32 %v1609_v6, %v1432_v30 }
 0x40f   :  { %1485 = vst [vmem:[#allocation5] sm:$0xff] %v1469_v46 }
 0x410   :  { %1486 = vst [vmem:[#allocation5 + $0x8] sm:$0xff] %v1470_v14 }
 0x425   :  { %v1452_v0 = vpop.permute.xlu0 %1451 }
 0x426   :  { %v1477_v11 = vmul.f32 %v1610_v27, %v1452_v0  ;;  %v1478_v43 = vmul.f32 %v1611_v28, %v1452_v0 }
 0x428   :  { %1493 = vst [vmem:[#allocation5 + $0x40] sm:$0xff] %v1477_v11 }
 0x429   :  { %1494 = vst [vmem:[#allocation5 + $0x48] sm:$0xff] %v1478_v43 }
 0x42a   :  { %v1442_v8 = vpop.permute.xlu2 %1441 }
 0x42b   :  { %v1473_v59 = vmul.f32 %v1612_v29, %v1442_v8  ;;  %v1474_v58 = vmul.f32 %v1613_v32, %v1442_v8 }
 0x42d   :  { %1489 = vst [vmem:[#allocation5 + $0x20] sm:$0xff] %v1473_v59 }
 0x42e   :  { %1490 = vst [vmem:[#allocation5 + $0x28] sm:$0xff] %v1474_v58 }
 0x432   :  { %v1457_v36 = vpop.permute.xlu2 %1456 }
 0x433   :  { %v1479_v23 = vmul.f32 %v1614_v33, %v1457_v36  ;;  %v1480_v42 = vmul.f32 %v1615_v37, %v1457_v36 }
 0x435   :  { %1495 = vst [vmem:[#allocation5 + $0x50] sm:$0xff] %v1479_v23 }
 0x436   :  { %1496 = vst [vmem:[#allocation5 + $0x58] sm:$0xff] %v1480_v42  ;;  %v1437_v34 = vpop.permute.xlu1 %1436 }
 0x437   :  { %v1471_v45 = vmul.f32 %v1616_v38, %v1437_v34  ;;  %v1472_v22 = vmul.f32 %v1617_v62, %v1437_v34 }
 0x439   :  { %1487 = vst [vmem:[#allocation5 + $0x10] sm:$0xff] %v1471_v45 }
 0x43a   :  { %1488 = vst [vmem:[#allocation5 + $0x18] sm:$0xff] %v1472_v22  ;;  %v1467_v53 = vpop.permute.xlu2 %1466 }
 0x43b   :  { %v1483_v20 = vmul.f32 %v1618_v56, %v1467_v53  ;;  %v1484_v35 = vmul.f32 %v1619_v9, %v1467_v53 }
 0x43d   :  { %1499 = vst [vmem:[#allocation5 + $0x70] sm:$0xff] %v1483_v20 }
 0x43e   :  { %1500 = vst [vmem:[#allocation5 + $0x78] sm:$0xff] %v1484_v35  ;;  %v1447_v41 = vpop.permute.xlu1 %1446 }
 0x43f   :  { %v1475_v31 = vmul.f32 %v1620_v48, %v1447_v41  ;;  %v1476_v4 = vmul.f32 %v1621_v51, %v1447_v41 }
 0x441   :  { %1491 = vst [vmem:[#allocation5 + $0x30] sm:$0xff] %v1475_v31 }
 0x442   :  { %1492 = vst [vmem:[#allocation5 + $0x38] sm:$0xff] %v1476_v4 }
 0x446   :  { %v1462_v7 = vpop.permute.xlu1 %1461 }
 0x447   :  { %v1481_v2 = vmul.f32 %v1622_v26, %v1462_v7  ;;  %v1482_v13 = vmul.f32 %v1623_v40, %v1462_v7 }
 0x449   :  { %1497 = vst [vmem:[#allocation5 + $0x60] sm:$0xff] %v1481_v2 }
 0x44a   :  { %1498 = vst [vmem:[#allocation5 + $0x68] sm:$0xff] %v1482_v13 }
 0x44b   :  { %1513 = dma.vmem_to_hbm [thread:$0]  %s1506_s10, 2048, %s1508_s13, [#allocation4], %s1677_s23, %s1677_s23, %s1678_s24  }
 0x44c   :  { %1674 = dma.done.wait [#allocation4], 2048  }
 0x44d   :  { %1675 = vsyncadd [#allocation4], 4294965248 }
 0x44e   :  { %1518 = vsyncpa [#allocation3], 1 }
 0x44f   :  { %1519 = vsyncpa [#allocation4], 1 }

</bundles_post_ra>
